<compile_context>
chip_gen: v7x
topology: tpu7x:2x2x1
jax: 0.10.0
libtpu: 0.0.40
codegen_flags: <defaults>
</compile_context>

<pallas_src>
import math

import jax
import jax.numpy as jnp
from jax.experimental import pallas as pl
from jax.experimental.pallas import tpu as pltpu

MASK_NEG = -10000.0


# ---------------------------------------------------------------------------
# In-kernel helpers (operate on loaded jnp values)
# ---------------------------------------------------------------------------
def _layer_norm(x, gamma, beta, eps=1e-5):
    # x: (S, E) f32; gamma/beta: (1, E) f32
    mu = jnp.mean(x, axis=-1, keepdims=True)
    var = jnp.mean((x - mu) ** 2, axis=-1, keepdims=True)
    return (x - mu) * jax.lax.rsqrt(var + eps) * gamma + beta


def _mha(x_q, x_kv, mask_bias, wqkv, bqkv, wo, bo):
    """Head-batched multi-head attention for one sequence.

    x_q:(Sq,E) f32   x_kv:(Sk,E) f32   mask_bias:(Sq,Sk) f32 or None
    wqkv:(3,H,E,hd) bf16 (q weights pre-scaled by 1/sqrt(hd) outside the kernel)
    bqkv:(3,H,1,hd) f32    wo:(H,hd,E) bf16    bo:(1,E) f32
    """
    H = wqkv.shape[1]
    Sq, E = x_q.shape
    Sk = x_kv.shape[0]
    cdt = wqkv.dtype

    # Batched (leading head axis) projections: contraction over full E.
    # Total FLOPs equal a single dense (S,E)@(E,E) matmul (per-head weights
    # are (E, hd) slices of the dense projection).
    xq = jnp.broadcast_to(x_q.astype(cdt), (H, Sq, E))
    if x_kv is x_q:                       # self-attention: share the broadcast
        xkv = xq
    else:
        xkv = jnp.broadcast_to(x_kv.astype(cdt), (H, Sk, E))
    q = jnp.einsum('hse,hed->hsd', xq, wqkv[0],
                   preferred_element_type=jnp.float32) + bqkv[0]
    k = jnp.einsum('hse,hed->hsd', xkv, wqkv[1],
                   preferred_element_type=jnp.float32) + bqkv[1]
    v = jnp.einsum('hse,hed->hsd', xkv, wqkv[2],
                   preferred_element_type=jnp.float32) + bqkv[2]

    # Scores / softmax (f32 math, EUP reciprocal).
    scores = jnp.einsum('hqd,hkd->hqk', q.astype(cdt), k.astype(cdt),
                        preferred_element_type=jnp.float32)
    if mask_bias is not None:
        scores = scores + mask_bias[None, :, :]
    scores = scores - jnp.max(scores, axis=-1, keepdims=True)
    p = jnp.exp(scores)
    p = p * pl.reciprocal(jnp.sum(p, axis=-1, keepdims=True), approx=True)

    # Context and output projection; per-head contributions summed (no concat).
    ctx = jnp.einsum('hqk,hkd->hqd', p.astype(cdt), v.astype(cdt),
                     preferred_element_type=jnp.float32)
    out_h = jnp.einsum('hqd,hde->hqe', ctx.astype(cdt), wo,
                       preferred_element_type=jnp.float32)     # (H, Sq, E)
    return jnp.sum(out_h, axis=0) + bo


# ---------------------------------------------------------------------------
# Fused decoder-stack kernel (all layers + final linear/softmax in one call)
# ---------------------------------------------------------------------------
def decoder_stack_kernel(x_ref, enc_ref, mask_ref,
                         sa_wqkv_ref, sa_bqkv_ref, sa_wo_ref, sa_bo_ref,
                         ca_wqkv_ref, ca_bqkv_ref, ca_wo_ref, ca_bo_ref,
                         w_mlp_ref, b_mlp_ref, ln_ref,
                         w_out_ref, b_out_ref, out_ref):
    layer = pl.program_id(1)
    n_layers = pl.num_programs(1)

    # Initialize the VMEM-resident carry (out_ref block index is constant
    # along the layer axis) from the embedded input on the first layer.
    @pl.when(layer == 0)
    def _():
        out_ref[...] = x_ref[...].astype(jnp.float32)

    x = out_ref[...]                       # (S, E) f32, carried across layers
    mask_bias = mask_ref[...]              # (S, S) f32 additive bias
    ln = ln_ref[...]                       # (3, 2, E) f32

    # masked self-attention + residual + LayerNorm
    sa = _mha(x, x, mask_bias, sa_wqkv_ref[...], sa_bqkv_ref[...],
              sa_wo_ref[...], sa_bo_ref[...])
    x = _layer_norm(x + sa, ln[0, 0:1, :], ln[0, 1:2, :])

    # cross-attention (no mask; matches reference passing attn_mask=None)
    # TODO(synk): assumes encoder length == decoder length S, as in the demo.
    enc = enc_ref[...].astype(jnp.float32)
    ca = _mha(x, enc, None, ca_wqkv_ref[...], ca_bqkv_ref[...],
              ca_wo_ref[...], ca_bo_ref[...])
    x = _layer_norm(x + ca, ln[1, 0:1, :], ln[1, 1:2, :])

    # MLP: Linear -> ReLU -> Linear, residual + LayerNorm
    w_mlp = w_mlp_ref[...]
    b_mlp = b_mlp_ref[...]
    cdt = w_mlp.dtype
    h = jnp.dot(x.astype(cdt), w_mlp[0],
                preferred_element_type=jnp.float32) + b_mlp[0:1, :]
    h = jnp.maximum(h, 0.0)
    m = jnp.dot(h.astype(cdt), w_mlp[1],
                preferred_element_type=jnp.float32) + b_mlp[1:2, :]
    x = _layer_norm(x + m, ln[2, 0:1, :], ln[2, 1:2, :])

    out_ref[...] = x                       # keep carry resident for next layer

    # Final Linear + Softmax fused into the last layer iteration.
    @pl.when(layer == n_layers - 1)
    def _():
        w_out = w_out_ref[...]
        logits = jnp.dot(x.astype(w_out.dtype), w_out,
                         preferred_element_type=jnp.float32) + b_out_ref[...]
        logits = logits - jnp.max(logits, axis=-1, keepdims=True)
        e = jnp.exp(logits)
        out_ref[...] = e / jnp.sum(e, axis=-1, keepdims=True)


def decoder_stack(x, enc, mask_bias, st, num_heads):
    B, S, E = x.shape
    L = st["sa_wqkv"].shape[0]
    H = num_heads
    hd = E // H

    in_specs = [
        pl.BlockSpec((None, S, E), lambda b, l: (b, 0, 0)),            # x (emb+pe)
        pl.BlockSpec((None, S, E), lambda b, l: (b, 0, 0)),            # encoder out
        pl.BlockSpec((None, S, S), lambda b, l: (0, 0, 0)),            # mask bias
        pl.BlockSpec((None, 3, H, E, hd), lambda b, l: (l, 0, 0, 0, 0)),  # sa Wqkv
        pl.BlockSpec((None, 3, H, 1, hd), lambda b, l: (l, 0, 0, 0, 0)),  # sa bqkv
        pl.BlockSpec((None, H, hd, E), lambda b, l: (l, 0, 0, 0)),        # sa Wo
        pl.BlockSpec((None, 1, E), lambda b, l: (l, 0, 0)),               # sa bo
        pl.BlockSpec((None, 3, H, E, hd), lambda b, l: (l, 0, 0, 0, 0)),  # ca Wqkv
        pl.BlockSpec((None, 3, H, 1, hd), lambda b, l: (l, 0, 0, 0, 0)),  # ca bqkv
        pl.BlockSpec((None, H, hd, E), lambda b, l: (l, 0, 0, 0)),        # ca Wo
        pl.BlockSpec((None, 1, E), lambda b, l: (l, 0, 0)),               # ca bo
        pl.BlockSpec((None, 2, E, E), lambda b, l: (l, 0, 0, 0)),         # MLP W
        pl.BlockSpec((None, 2, E), lambda b, l: (l, 0, 0)),               # MLP b
        pl.BlockSpec((None, 3, 2, E), lambda b, l: (l, 0, 0, 0)),         # LN g/b x3
        pl.BlockSpec((E, E), lambda b, l: (0, 0)),                        # final W
        pl.BlockSpec((1, E), lambda b, l: (0, 0)),                        # final b
    ]
    out_specs = pl.BlockSpec((None, S, E), lambda b, l: (b, 0, 0))

    return pl.pallas_call(
        decoder_stack_kernel,
        out_shape=jax.ShapeDtypeStruct((B, S, E), jnp.float32),
        grid=(B, L),
        in_specs=in_specs,
        out_specs=out_specs,
        compiler_params=pltpu.CompilerParams(
            dimension_semantics=("parallel", "arbitrary")),
    )(x, enc, mask_bias,
      st["sa_wqkv"], st["sa_bqkv"], st["sa_wo"], st["sa_bo"],
      st["ca_wqkv"], st["ca_bqkv"], st["ca_wo"], st["ca_bo"],
      st["w_mlp"], st["b_mlp"], st["ln"],
      st["w_out"], st["b_out"])


# ---------------------------------------------------------------------------
# Parameter preparation (head-major layout, scale folding, bf16 matmul inputs)
# ---------------------------------------------------------------------------
def _head_major_attn(w, b, num_heads, compute_dtype):
    # w: (4, E, E) = [Wq, Wk, Wv, Wo] stored (in, out); b: (4, E)
    E = w.shape[-1]
    hd = E // num_heads
    scale = 1.0 / math.sqrt(hd)
    wq = w[0] * scale          # fold 1/sqrt(hd) into the Q projection
    bq = b[0] * scale

    def hm(m):                 # (E, E) -> (H, E, hd) head-major
        return m.reshape(E, num_heads, hd).transpose(1, 0, 2)

    wqkv = jnp.stack([hm(wq), hm(w[1]), hm(w[2])]).astype(compute_dtype)
    bqkv = jnp.stack([bq, b[1], b[2]]).reshape(
        3, num_heads, 1, hd).astype(jnp.float32)
    wo = w[3].reshape(num_heads, hd, E).astype(compute_dtype)
    bo = b[3].reshape(1, E).astype(jnp.float32)
    return wqkv, bqkv, wo, bo


def prepare_stacked_params(params, num_heads, compute_dtype=jnp.bfloat16):
    blocks = params["blocks"]
    sa = [_head_major_attn(bp["w_sa"], bp["b_sa"], num_heads, compute_dtype)
          for bp in blocks]
    ca = [_head_major_attn(bp["w_ca"], bp["b_ca"], num_heads, compute_dtype)
          for bp in blocks]
    return {
        "sa_wqkv": jnp.stack([t[0] for t in sa]),
        "sa_bqkv": jnp.stack([t[1] for t in sa]),
        "sa_wo":   jnp.stack([t[2] for t in sa]),
        "sa_bo":   jnp.stack([t[3] for t in sa]),
        "ca_wqkv": jnp.stack([t[0] for t in ca]),
        "ca_bqkv": jnp.stack([t[1] for t in ca]),
        "ca_wo":   jnp.stack([t[2] for t in ca]),
        "ca_bo":   jnp.stack([t[3] for t in ca]),
        "w_mlp":   jnp.stack([bp["w_mlp"] for bp in blocks]).astype(compute_dtype),
        "b_mlp":   jnp.stack([bp["b_mlp"] for bp in blocks]).astype(jnp.float32),
        "ln":      jnp.stack([bp["ln"] for bp in blocks]).astype(jnp.float32),
        "w_out":   params["w_out"].astype(compute_dtype),
        "b_out":   params["b_out"].astype(jnp.float32),
    }


# ---------------------------------------------------------------------------
# Glue: embedding (max_norm), sinusoidal positional encoding, param init
# ---------------------------------------------------------------------------
def embed(tokens, emb_table):
    # nn.Embedding(..., max_norm=True) -> rows renormalized to max L2 norm 1.0
    vecs = emb_table[tokens]                               # (B, S, E) gather (glue)
    norms = jnp.linalg.norm(vecs, axis=-1, keepdims=True)
    scale = jnp.where(norms > 1.0, 1.0 / jnp.maximum(norms, 1e-12), 1.0)
    return vecs * scale


def sinusoidal_pe(S, E):
    # TODO(synk): `PositionalEncodeing` class not provided in the reference;
    # using the standard sinusoidal absolute positional encoding.
    pos = jnp.arange(S, dtype=jnp.float32)[:, None]
    i = jnp.arange(E // 2, dtype=jnp.float32)[None, :]
    ang = pos / jnp.power(10000.0, 2.0 * i / E)
    pe = jnp.zeros((S, E), jnp.float32)
    pe = pe.at[:, 0::2].set(jnp.sin(ang))
    pe = pe.at[:, 1::2].set(jnp.cos(ang))
    return pe


def init_params(key, num_emb, emb_dim, n_blocks):
    keys = jax.random.split(key, 3 + n_blocks)
    s = 1.0 / math.sqrt(emb_dim)
    params = {
        "emb": jax.random.normal(keys[0], (num_emb, emb_dim), jnp.float32) * 0.5,
        "w_out": jax.random.normal(keys[1], (emb_dim, emb_dim), jnp.float32) * s,
        "b_out": jax.random.normal(keys[2], (1, emb_dim), jnp.float32) * 0.01,
        "blocks": [],
    }
    ln_init = jnp.stack(
        [jnp.stack([jnp.ones(emb_dim, jnp.float32),
                    jnp.zeros(emb_dim, jnp.float32)])] * 3)   # (3, 2, E)
    for i in range(n_blocks):
        bk = jax.random.split(keys[3 + i], 6)
        params["blocks"].append({
            "w_sa": jax.random.normal(bk[0], (4, emb_dim, emb_dim), jnp.float32) * s,
            "b_sa": jax.random.normal(bk[1], (4, emb_dim), jnp.float32) * 0.01,
            "w_ca": jax.random.normal(bk[2], (4, emb_dim, emb_dim), jnp.float32) * s,
            "b_ca": jax.random.normal(bk[3], (4, emb_dim), jnp.float32) * 0.01,
            "w_mlp": jax.random.normal(bk[4], (2, emb_dim, emb_dim), jnp.float32) * s,
            "b_mlp": jax.random.normal(bk[5], (2, emb_dim), jnp.float32) * 0.01,
            "ln": ln_init,
        })
    return params


def decoder_forward(tokens, encoder_output, attn_mask, params, num_heads):
    B, S = tokens.shape
    E = params["emb"].shape[-1]
    # JAX-side glue: embedding gather + positional encoding + mask-bias (once).
    x = (embed(tokens, params["emb"]) + sinusoidal_pe(S, E)[None]).astype(jnp.float32)
    mask_bias = ((1.0 - attn_mask.astype(jnp.float32)) * MASK_NEG).reshape(1, S, S)
    st = prepare_stacked_params(params, num_heads)
    return decoder_stack(x, encoder_output.astype(jnp.float32),
                         mask_bias, st, num_heads)


# ---------------------------------------------------------------------------
if __name__ == "__main__":
    NUM_EMB, EMB_DIM, NUM_HEADS, N_BLOCKS = 50, 32, 4, 2
    B, S = 2, 8

    key = jax.random.PRNGKey(0)
    k_tok, k_enc, k_par = jax.random.split(key, 3)

    tokens = jax.random.randint(k_tok, (B, S), 0, NUM_EMB, dtype=jnp.int32)
    encoder_output = jax.random.normal(k_enc, (B, S, EMB_DIM), jnp.float32)
    # causal mask (1 = attend, 0 = masked), shared across batch/heads
    attn_mask = jnp.tril(jnp.ones((1, S, S), jnp.float32))

    params = init_params(k_par, NUM_EMB, EMB_DIM, N_BLOCKS)

    out = decoder_forward(tokens, encoder_output, attn_mask, params, NUM_HEADS)
    out = jax.block_until_ready(out)

    assert out.shape == (B, S, EMB_DIM)
    assert bool(jnp.all(jnp.isfinite(out)))
    # rows of the final softmax should sum to ~1
    assert bool(jnp.allclose(jnp.sum(out, axis=-1), 1.0, atol=1e-4))
    print("KERNEL_OK")
</pallas_src>

<mosaic_0001>
module attributes {stable_mosaic.version = 11 : i64} {
  func.func @decoder_stack_kernel(%arg0: i32, %arg1: i32, %arg2: memref<1x8x32xf32, #tpu.memory_space<vmem>>, %arg3: memref<1x8x32xf32, #tpu.memory_space<vmem>>, %arg4: memref<1x8x8xf32, #tpu.memory_space<vmem>>, %arg5: memref<1x3x4x32x8xbf16, #tpu.memory_space<vmem>>, %arg6: memref<1x3x4x1x8xf32, #tpu.memory_space<vmem>>, %arg7: memref<1x4x8x32xbf16, #tpu.memory_space<vmem>>, %arg8: memref<1x1x32xf32, #tpu.memory_space<vmem>>, %arg9: memref<1x3x4x32x8xbf16, #tpu.memory_space<vmem>>, %arg10: memref<1x3x4x1x8xf32, #tpu.memory_space<vmem>>, %arg11: memref<1x4x8x32xbf16, #tpu.memory_space<vmem>>, %arg12: memref<1x1x32xf32, #tpu.memory_space<vmem>>, %arg13: memref<1x2x32x32xbf16, #tpu.memory_space<vmem>>, %arg14: memref<1x2x32xf32, #tpu.memory_space<vmem>>, %arg15: memref<1x3x2x32xf32, #tpu.memory_space<vmem>>, %arg16: memref<32x32xbf16, #tpu.memory_space<vmem>>, %arg17: memref<1x32xf32, #tpu.memory_space<vmem>>, %arg18: memref<1x8x32xf32, #tpu.memory_space<vmem>>) attributes {dimension_semantics = [#tpu.dimension_semantics<parallel>, #tpu.dimension_semantics<arbitrary>], iteration_bounds = array<i64: 2, 2>, scalar_prefetch = 0 : i64, scratch_operands = 0 : i64, tpu.core_type = #tpu.core_type<tc>, window_params = [{transform_indices = @transform_0, window_bounds = array<i64: 1, 8, 32>}, {transform_indices = @transform_1, window_bounds = array<i64: 1, 8, 32>}, {pipeline_mode = #tpu.pipeline_mode<synchronous>, transform_indices = @transform_2, window_bounds = array<i64: 1, 8, 8>}, {transform_indices = @transform_3, window_bounds = array<i64: 1, 3, 4, 32, 8>}, {transform_indices = @transform_4, window_bounds = array<i64: 1, 3, 4, 1, 8>}, {transform_indices = @transform_5, window_bounds = array<i64: 1, 4, 8, 32>}, {transform_indices = @transform_6, window_bounds = array<i64: 1, 1, 32>}, {transform_indices = @transform_7, window_bounds = array<i64: 1, 3, 4, 32, 8>}, {transform_indices = @transform_8, window_bounds = array<i64: 1, 3, 4, 1, 8>}, {transform_indices = @transform_9, window_bounds = array<i64: 1, 4, 8, 32>}, {transform_indices = @transform_10, window_bounds = array<i64: 1, 1, 32>}, {transform_indices = @transform_11, window_bounds = array<i64: 1, 2, 32, 32>}, {transform_indices = @transform_12, window_bounds = array<i64: 1, 2, 32>}, {transform_indices = @transform_13, window_bounds = array<i64: 1, 3, 2, 32>}, {pipeline_mode = #tpu.pipeline_mode<synchronous>, transform_indices = @transform_14, window_bounds = array<i64: 32, 32>}, {pipeline_mode = #tpu.pipeline_mode<synchronous>, transform_indices = @transform_15, window_bounds = array<i64: 1, 32>}, {transform_indices = @transform_16, window_bounds = array<i64: 1, 8, 32>}]} {
    %c0_i32 = arith.constant 0 : i32
    %0 = arith.cmpi eq, %arg1, %c0_i32 : i32
    %1 = arith.extui %0 : i1 to i32
    %c0_i32_0 = arith.constant 0 : i32
    %2 = arith.cmpi ne, %1, %c0_i32_0 : i32
    scf.if %2 {
      %c0_93 = arith.constant 0 : index
      %c0_94 = arith.constant 0 : index
      %c0_95 = arith.constant 0 : index
      %230 = vector.load %arg2[%c0_93, %c0_94, %c0_95] : memref<1x8x32xf32, #tpu.memory_space<vmem>>, vector<1x8x32xf32>
      %231 = vector.shape_cast %230 : vector<1x8x32xf32> to vector<8x32xf32>
      %c0_96 = arith.constant 0 : index
      %c0_97 = arith.constant 0 : index
      %c0_98 = arith.constant 0 : index
      %232 = vector.load %arg18[%c0_96, %c0_97, %c0_98] : memref<1x8x32xf32, #tpu.memory_space<vmem>>, vector<1x8x32xf32>
      %233 = vector.shape_cast %232 : vector<1x8x32xf32> to vector<8x32xf32>
      %234 = vector.shape_cast %231 : vector<8x32xf32> to vector<1x8x32xf32>
      tpu.vector_store %arg18[%c0_96, %c0_97, %c0_98], %234 {strides = array<i32>} : memref<1x8x32xf32, #tpu.memory_space<vmem>>, vector<1x8x32xf32>,
    } else {
    }
    %c0 = arith.constant 0 : index
    %c0_1 = arith.constant 0 : index
    %c0_2 = arith.constant 0 : index
    %3 = vector.load %arg18[%c0, %c0_1, %c0_2] : memref<1x8x32xf32, #tpu.memory_space<vmem>>, vector<1x8x32xf32>
    %4 = vector.shape_cast %3 : vector<1x8x32xf32> to vector<8x32xf32>
    %c0_3 = arith.constant 0 : index
    %c0_4 = arith.constant 0 : index
    %c0_5 = arith.constant 0 : index
    %5 = vector.load %arg4[%c0_3, %c0_4, %c0_5] : memref<1x8x8xf32, #tpu.memory_space<vmem>>, vector<1x8x8xf32>
    %6 = vector.shape_cast %5 : vector<1x8x8xf32> to vector<8x8xf32>
    %c0_6 = arith.constant 0 : index
    %c0_7 = arith.constant 0 : index
    %c0_8 = arith.constant 0 : index
    %c0_9 = arith.constant 0 : index
    %7 = vector.load %arg15[%c0_6, %c0_7, %c0_8, %c0_9] : memref<1x3x2x32xf32, #tpu.memory_space<vmem>>, vector<1x3x2x32xf32>
    %8 = vector.shape_cast %7 : vector<1x3x2x32xf32> to vector<3x2x32xf32>
    %c0_10 = arith.constant 0 : index
    %c0_11 = arith.constant 0 : index
    %c0_12 = arith.constant 0 : index
    %c0_13 = arith.constant 0 : index
    %c0_14 = arith.constant 0 : index
    %9 = vector.load %arg5[%c0_10, %c0_11, %c0_12, %c0_13, %c0_14] : memref<1x3x4x32x8xbf16, #tpu.memory_space<vmem>>, vector<1x3x4x32x8xbf16>
    %10 = vector.shape_cast %9 : vector<1x3x4x32x8xbf16> to vector<3x4x32x8xbf16>
    %c0_15 = arith.constant 0 : index
    %c0_16 = arith.constant 0 : index
    %c0_17 = arith.constant 0 : index
    %c0_18 = arith.constant 0 : index
    %c0_19 = arith.constant 0 : index
    %11 = vector.load %arg6[%c0_15, %c0_16, %c0_17, %c0_18, %c0_19] : memref<1x3x4x1x8xf32, #tpu.memory_space<vmem>>, vector<1x3x4x1x8xf32>
    %12 = vector.shape_cast %11 : vector<1x3x4x1x8xf32> to vector<3x4x1x8xf32>
    %c0_20 = arith.constant 0 : index
    %c0_21 = arith.constant 0 : index
    %c0_22 = arith.constant 0 : index
    %c0_23 = arith.constant 0 : index
    %13 = vector.load %arg7[%c0_20, %c0_21, %c0_22, %c0_23] : memref<1x4x8x32xbf16, #tpu.memory_space<vmem>>, vector<1x4x8x32xbf16>
    %14 = vector.shape_cast %13 : vector<1x4x8x32xbf16> to vector<4x8x32xbf16>
    %c0_24 = arith.constant 0 : index
    %c0_25 = arith.constant 0 : index
    %c0_26 = arith.constant 0 : index
    %15 = vector.load %arg8[%c0_24, %c0_25, %c0_26] : memref<1x1x32xf32, #tpu.memory_space<vmem>>, vector<1x1x32xf32>
    %16 = vector.shape_cast %15 : vector<1x1x32xf32> to vector<1x32xf32>
    %17 = arith.truncf %4 : vector<8x32xf32> to vector<8x32xbf16>
    %18 = vector.shape_cast %17 : vector<8x32xbf16> to vector<1x8x32xbf16>
    %19 = vector.broadcast %18 : vector<1x8x32xbf16> to vector<4x8x32xbf16>
    %20 = vector.extract_strided_slice %10 {offsets = [0, 0, 0, 0], sizes = [1, 4, 32, 8], strides = [1, 1, 1, 1]} : vector<3x4x32x8xbf16> to vector<1x4x32x8xbf16>
    %21 = vector.shape_cast %20 : vector<1x4x32x8xbf16> to vector<4x32x8xbf16>
    "tpu.trace_start"() <{level = 10 : i32, message = "hse,hed->hsd"}> : () -> ()
    %cst = arith.constant dense<0.000000e+00> : vector<4x8x8xf32>
    %22 = tpu.matmul %19, %21, %cst {dimension_numbers = #tpu.dot_dimension_numbers<[2], [1], [1], [2], [0, 0, 0, 1, 1, 2], [0], [0]>} : vector<4x8x32xbf16>, vector<4x32x8xbf16>, vector<4x8x8xf32> -> vector<4x8x8xf32>
    "tpu.trace_stop"() : () -> ()
    %23 = vector.extract_strided_slice %12 {offsets = [0, 0, 0, 0], sizes = [1, 4, 1, 8], strides = [1, 1, 1, 1]} : vector<3x4x1x8xf32> to vector<1x4x1x8xf32>
    %24 = vector.shape_cast %23 : vector<1x4x1x8xf32> to vector<4x1x8xf32>
    %25 = vector.broadcast %24 : vector<4x1x8xf32> to vector<4x8x8xf32>
    %26 = arith.addf %22, %25 : vector<4x8x8xf32>
    %27 = vector.extract_strided_slice %10 {offsets = [1, 0, 0, 0], sizes = [1, 4, 32, 8], strides = [1, 1, 1, 1]} : vector<3x4x32x8xbf16> to vector<1x4x32x8xbf16>
    %28 = vector.shape_cast %27 : vector<1x4x32x8xbf16> to vector<4x32x8xbf16>
    "tpu.trace_start"() <{level = 10 : i32, message = "hse,hed->hsd"}> : () -> ()
    %cst_27 = arith.constant dense<0.000000e+00> : vector<4x8x8xf32>
    %29 = tpu.matmul %19, %28, %cst_27 {dimension_numbers = #tpu.dot_dimension_numbers<[2], [1], [1], [2], [0, 0, 0, 1, 1, 2], [0], [0]>} : vector<4x8x32xbf16>, vector<4x32x8xbf16>, vector<4x8x8xf32> -> vector<4x8x8xf32>
    "tpu.trace_stop"() : () -> ()
    %30 = vector.extract_strided_slice %12 {offsets = [1, 0, 0, 0], sizes = [1, 4, 1, 8], strides = [1, 1, 1, 1]} : vector<3x4x1x8xf32> to vector<1x4x1x8xf32>
    %31 = vector.shape_cast %30 : vector<1x4x1x8xf32> to vector<4x1x8xf32>
    %32 = vector.broadcast %31 : vector<4x1x8xf32> to vector<4x8x8xf32>
    %33 = arith.addf %29, %32 : vector<4x8x8xf32>
    %34 = vector.extract_strided_slice %10 {offsets = [2, 0, 0, 0], sizes = [1, 4, 32, 8], strides = [1, 1, 1, 1]} : vector<3x4x32x8xbf16> to vector<1x4x32x8xbf16>
    %35 = vector.shape_cast %34 : vector<1x4x32x8xbf16> to vector<4x32x8xbf16>
    "tpu.trace_start"() <{level = 10 : i32, message = "hse,hed->hsd"}> : () -> ()
    %cst_28 = arith.constant dense<0.000000e+00> : vector<4x8x8xf32>
    %36 = tpu.matmul %19, %35, %cst_28 {dimension_numbers = #tpu.dot_dimension_numbers<[2], [1], [1], [2], [0, 0, 0, 1, 1, 2], [0], [0]>} : vector<4x8x32xbf16>, vector<4x32x8xbf16>, vector<4x8x8xf32> -> vector<4x8x8xf32>
    "tpu.trace_stop"() : () -> ()
    %37 = vector.extract_strided_slice %12 {offsets = [2, 0, 0, 0], sizes = [1, 4, 1, 8], strides = [1, 1, 1, 1]} : vector<3x4x1x8xf32> to vector<1x4x1x8xf32>
    %38 = vector.shape_cast %37 : vector<1x4x1x8xf32> to vector<4x1x8xf32>
    %39 = vector.broadcast %38 : vector<4x1x8xf32> to vector<4x8x8xf32>
    %40 = arith.addf %36, %39 : vector<4x8x8xf32>
    %41 = arith.truncf %26 : vector<4x8x8xf32> to vector<4x8x8xbf16>
    %42 = arith.truncf %33 : vector<4x8x8xf32> to vector<4x8x8xbf16>
    "tpu.trace_start"() <{level = 10 : i32, message = "hqd,hkd->hqk"}> : () -> ()
    %cst_29 = arith.constant dense<0.000000e+00> : vector<4x8x8xf32>
    %43 = tpu.matmul %41, %42, %cst_29 {dimension_numbers = #tpu.dot_dimension_numbers<[2], [2], [1], [1], [0, 0, 0, 1, 1, 1], [0], [0]>} : vector<4x8x8xbf16>, vector<4x8x8xbf16>, vector<4x8x8xf32> -> vector<4x8x8xf32>
    "tpu.trace_stop"() : () -> ()
    %44 = vector.shape_cast %6 : vector<8x8xf32> to vector<1x8x8xf32>
    %45 = vector.broadcast %44 : vector<1x8x8xf32> to vector<4x8x8xf32>
    %46 = arith.addf %43, %45 : vector<4x8x8xf32>
    %cst_30 = arith.constant dense<0xFF800000> : vector<4x8xf32>
    %47 = vector.multi_reduction <maximumf>, %46, %cst_30 [2] : vector<4x8x8xf32> to vector<4x8xf32>
    %48 = vector.shape_cast %47 : vector<4x8xf32> to vector<4x8x1xf32>
    %49 = vector.broadcast %48 : vector<4x8x1xf32> to vector<4x8x8xf32>
    %50 = arith.subf %46, %49 : vector<4x8x8xf32>
    %51 = math.exp %50 : vector<4x8x8xf32>
    %cst_31 = arith.constant dense<0.000000e+00> : vector<4x8xf32>
    %52 = vector.multi_reduction <add>, %51, %cst_31 [2] : vector<4x8x8xf32> to vector<4x8xf32>
    %53 = vector.shape_cast %52 : vector<4x8xf32> to vector<4x8x1xf32>
    %54 = tpu.reciprocal %53 {approx = true} : vector<4x8x1xf32> -> vector<4x8x1xf32>
    %55 = vector.broadcast %54 : vector<4x8x1xf32> to vector<4x8x8xf32>
    %56 = arith.mulf %51, %55 : vector<4x8x8xf32>
    %57 = arith.truncf %56 : vector<4x8x8xf32> to vector<4x8x8xbf16>
    %58 = arith.truncf %40 : vector<4x8x8xf32> to vector<4x8x8xbf16>
    "tpu.trace_start"() <{level = 10 : i32, message = "hqk,hkd->hqd"}> : () -> ()
    %cst_32 = arith.constant dense<0.000000e+00> : vector<4x8x8xf32>
    %59 = tpu.matmul %57, %58, %cst_32 {dimension_numbers = #tpu.dot_dimension_numbers<[2], [1], [1], [2], [0, 0, 0, 1, 1, 2], [0], [0]>} : vector<4x8x8xbf16>, vector<4x8x8xbf16>, vector<4x8x8xf32> -> vector<4x8x8xf32>
    "tpu.trace_stop"() : () -> ()
    %60 = arith.truncf %59 : vector<4x8x8xf32> to vector<4x8x8xbf16>
    "tpu.trace_start"() <{level = 10 : i32, message = "hqd,hde->hqe"}> : () -> ()
    %cst_33 = arith.constant dense<0.000000e+00> : vector<4x8x32xf32>
    %61 = tpu.matmul %60, %14, %cst_33 {dimension_numbers = #tpu.dot_dimension_numbers<[2], [1], [1], [2], [0, 0, 0, 1, 1, 2], [0], [0]>} : vector<4x8x8xbf16>, vector<4x8x32xbf16>, vector<4x8x32xf32> -> vector<4x8x32xf32>
    "tpu.trace_stop"() : () -> ()
    %cst_34 = arith.constant dense<0.000000e+00> : vector<8x32xf32>
    %62 = vector.multi_reduction <add>, %61, %cst_34 [0] : vector<4x8x32xf32> to vector<8x32xf32>
    %63 = vector.broadcast %16 : vector<1x32xf32> to vector<8x32xf32>
    %64 = arith.addf %62, %63 : vector<8x32xf32>
    %65 = arith.addf %4, %64 : vector<8x32xf32>
    %66 = vector.extract_strided_slice %8 {offsets = [0, 0, 0], sizes = [1, 1, 32], strides = [1, 1, 1]} : vector<3x2x32xf32> to vector<1x1x32xf32>
    %67 = vector.shape_cast %66 : vector<1x1x32xf32> to vector<1x32xf32>
    %68 = vector.extract_strided_slice %8 {offsets = [0, 1, 0], sizes = [1, 1, 32], strides = [1, 1, 1]} : vector<3x2x32xf32> to vector<1x1x32xf32>
    %69 = vector.shape_cast %68 : vector<1x1x32xf32> to vector<1x32xf32>
    %cst_35 = arith.constant dense<0.000000e+00> : vector<8xf32>
    %70 = vector.multi_reduction <add>, %65, %cst_35 [1] : vector<8x32xf32> to vector<8xf32>
    %71 = vector.shape_cast %70 : vector<8xf32> to vector<8x1xf32>
    %cst_36 = arith.constant 3.200000e+01 : f32
    %72 = vector.broadcast %cst_36 : f32 to vector<8x1xf32>
    %73 = arith.divf %71, %72 : vector<8x1xf32>
    %74 = vector.broadcast %73 : vector<8x1xf32> to vector<8x32xf32>
    %75 = arith.subf %65, %74 : vector<8x32xf32>
    %76 = arith.mulf %75, %75 : vector<8x32xf32>
    %cst_37 = arith.constant dense<0.000000e+00> : vector<8xf32>
    %77 = vector.multi_reduction <add>, %76, %cst_37 [1] : vector<8x32xf32> to vector<8xf32>
    %78 = vector.shape_cast %77 : vector<8xf32> to vector<8x1xf32>
    %cst_38 = arith.constant 3.200000e+01 : f32
    %79 = vector.broadcast %cst_38 : f32 to vector<8x1xf32>
    %80 = arith.divf %78, %79 : vector<8x1xf32>
    %81 = vector.broadcast %73 : vector<8x1xf32> to vector<8x32xf32>
    %82 = arith.subf %65, %81 : vector<8x32xf32>
    %cst_39 = arith.constant 9.99999974E-6 : f32
    %83 = vector.broadcast %cst_39 : f32 to vector<8x1xf32>
    %84 = arith.addf %80, %83 : vector<8x1xf32>
    %85 = math.rsqrt %84 : vector<8x1xf32>
    %86 = vector.broadcast %85 : vector<8x1xf32> to vector<8x32xf32>
    %87 = arith.mulf %82, %86 : vector<8x32xf32>
    %88 = vector.broadcast %67 : vector<1x32xf32> to vector<8x32xf32>
    %89 = arith.mulf %87, %88 : vector<8x32xf32>
    %90 = vector.broadcast %69 : vector<1x32xf32> to vector<8x32xf32>
    %91 = arith.addf %89, %90 : vector<8x32xf32>
    %c0_40 = arith.constant 0 : index
    %c0_41 = arith.constant 0 : index
    %c0_42 = arith.constant 0 : index
    %92 = vector.load %arg3[%c0_40, %c0_41, %c0_42] : memref<1x8x32xf32, #tpu.memory_space<vmem>>, vector<1x8x32xf32>
    %93 = vector.shape_cast %92 : vector<1x8x32xf32> to vector<8x32xf32>
    %c0_43 = arith.constant 0 : index
    %c0_44 = arith.constant 0 : index
    %c0_45 = arith.constant 0 : index
    %c0_46 = arith.constant 0 : index
    %c0_47 = arith.constant 0 : index
    %94 = vector.load %arg9[%c0_43, %c0_44, %c0_45, %c0_46, %c0_47] : memref<1x3x4x32x8xbf16, #tpu.memory_space<vmem>>, vector<1x3x4x32x8xbf16>
    %95 = vector.shape_cast %94 : vector<1x3x4x32x8xbf16> to vector<3x4x32x8xbf16>
    %c0_48 = arith.constant 0 : index
    %c0_49 = arith.constant 0 : index
    %c0_50 = arith.constant 0 : index
    %c0_51 = arith.constant 0 : index
    %c0_52 = arith.constant 0 : index
    %96 = vector.load %arg10[%c0_48, %c0_49, %c0_50, %c0_51, %c0_52] : memref<1x3x4x1x8xf32, #tpu.memory_space<vmem>>, vector<1x3x4x1x8xf32>
    %97 = vector.shape_cast %96 : vector<1x3x4x1x8xf32> to vector<3x4x1x8xf32>
    %c0_53 = arith.constant 0 : index
    %c0_54 = arith.constant 0 : index
    %c0_55 = arith.constant 0 : index
    %c0_56 = arith.constant 0 : index
    %98 = vector.load %arg11[%c0_53, %c0_54, %c0_55, %c0_56] : memref<1x4x8x32xbf16, #tpu.memory_space<vmem>>, vector<1x4x8x32xbf16>
    %99 = vector.shape_cast %98 : vector<1x4x8x32xbf16> to vector<4x8x32xbf16>
    %c0_57 = arith.constant 0 : index
    %c0_58 = arith.constant 0 : index
    %c0_59 = arith.constant 0 : index
    %100 = vector.load %arg12[%c0_57, %c0_58, %c0_59] : memref<1x1x32xf32, #tpu.memory_space<vmem>>, vector<1x1x32xf32>
    %101 = vector.shape_cast %100 : vector<1x1x32xf32> to vector<1x32xf32>
    %102 = arith.truncf %91 : vector<8x32xf32> to vector<8x32xbf16>
    %103 = vector.shape_cast %102 : vector<8x32xbf16> to vector<1x8x32xbf16>
    %104 = vector.broadcast %103 : vector<1x8x32xbf16> to vector<4x8x32xbf16>
    %105 = arith.truncf %93 : vector<8x32xf32> to vector<8x32xbf16>
    %106 = vector.shape_cast %105 : vector<8x32xbf16> to vector<1x8x32xbf16>
    %107 = vector.broadcast %106 : vector<1x8x32xbf16> to vector<4x8x32xbf16>
    %108 = vector.extract_strided_slice %95 {offsets = [0, 0, 0, 0], sizes = [1, 4, 32, 8], strides = [1, 1, 1, 1]} : vector<3x4x32x8xbf16> to vector<1x4x32x8xbf16>
    %109 = vector.shape_cast %108 : vector<1x4x32x8xbf16> to vector<4x32x8xbf16>
    "tpu.trace_start"() <{level = 10 : i32, message = "hse,hed->hsd"}> : () -> ()
    %cst_60 = arith.constant dense<0.000000e+00> : vector<4x8x8xf32>
    %110 = tpu.matmul %104, %109, %cst_60 {dimension_numbers = #tpu.dot_dimension_numbers<[2], [1], [1], [2], [0, 0, 0, 1, 1, 2], [0], [0]>} : vector<4x8x32xbf16>, vector<4x32x8xbf16>, vector<4x8x8xf32> -> vector<4x8x8xf32>
    "tpu.trace_stop"() : () -> ()
    %111 = vector.extract_strided_slice %97 {offsets = [0, 0, 0, 0], sizes = [1, 4, 1, 8], strides = [1, 1, 1, 1]} : vector<3x4x1x8xf32> to vector<1x4x1x8xf32>
    %112 = vector.shape_cast %111 : vector<1x4x1x8xf32> to vector<4x1x8xf32>
    %113 = vector.broadcast %112 : vector<4x1x8xf32> to vector<4x8x8xf32>
    %114 = arith.addf %110, %113 : vector<4x8x8xf32>
    %115 = vector.extract_strided_slice %95 {offsets = [1, 0, 0, 0], sizes = [1, 4, 32, 8], strides = [1, 1, 1, 1]} : vector<3x4x32x8xbf16> to vector<1x4x32x8xbf16>
    %116 = vector.shape_cast %115 : vector<1x4x32x8xbf16> to vector<4x32x8xbf16>
    "tpu.trace_start"() <{level = 10 : i32, message = "hse,hed->hsd"}> : () -> ()
    %cst_61 = arith.constant dense<0.000000e+00> : vector<4x8x8xf32>
    %117 = tpu.matmul %107, %116, %cst_61 {dimension_numbers = #tpu.dot_dimension_numbers<[2], [1], [1], [2], [0, 0, 0, 1, 1, 2], [0], [0]>} : vector<4x8x32xbf16>, vector<4x32x8xbf16>, vector<4x8x8xf32> -> vector<4x8x8xf32>
    "tpu.trace_stop"() : () -> ()
    %118 = vector.extract_strided_slice %97 {offsets = [1, 0, 0, 0], sizes = [1, 4, 1, 8], strides = [1, 1, 1, 1]} : vector<3x4x1x8xf32> to vector<1x4x1x8xf32>
    %119 = vector.shape_cast %118 : vector<1x4x1x8xf32> to vector<4x1x8xf32>
    %120 = vector.broadcast %119 : vector<4x1x8xf32> to vector<4x8x8xf32>
    %121 = arith.addf %117, %120 : vector<4x8x8xf32>
    %122 = vector.extract_strided_slice %95 {offsets = [2, 0, 0, 0], sizes = [1, 4, 32, 8], strides = [1, 1, 1, 1]} : vector<3x4x32x8xbf16> to vector<1x4x32x8xbf16>
    %123 = vector.shape_cast %122 : vector<1x4x32x8xbf16> to vector<4x32x8xbf16>
    "tpu.trace_start"() <{level = 10 : i32, message = "hse,hed->hsd"}> : () -> ()
    %cst_62 = arith.constant dense<0.000000e+00> : vector<4x8x8xf32>
    %124 = tpu.matmul %107, %123, %cst_62 {dimension_numbers = #tpu.dot_dimension_numbers<[2], [1], [1], [2], [0, 0, 0, 1, 1, 2], [0], [0]>} : vector<4x8x32xbf16>, vector<4x32x8xbf16>, vector<4x8x8xf32> -> vector<4x8x8xf32>
    "tpu.trace_stop"() : () -> ()
    %125 = vector.extract_strided_slice %97 {offsets = [2, 0, 0, 0], sizes = [1, 4, 1, 8], strides = [1, 1, 1, 1]} : vector<3x4x1x8xf32> to vector<1x4x1x8xf32>
    %126 = vector.shape_cast %125 : vector<1x4x1x8xf32> to vector<4x1x8xf32>
    %127 = vector.broadcast %126 : vector<4x1x8xf32> to vector<4x8x8xf32>
    %128 = arith.addf %124, %127 : vector<4x8x8xf32>
    %129 = arith.truncf %114 : vector<4x8x8xf32> to vector<4x8x8xbf16>
    %130 = arith.truncf %121 : vector<4x8x8xf32> to vector<4x8x8xbf16>
    "tpu.trace_start"() <{level = 10 : i32, message = "hqd,hkd->hqk"}> : () -> ()
    %cst_63 = arith.constant dense<0.000000e+00> : vector<4x8x8xf32>
    %131 = tpu.matmul %129, %130, %cst_63 {dimension_numbers = #tpu.dot_dimension_numbers<[2], [2], [1], [1], [0, 0, 0, 1, 1, 1], [0], [0]>} : vector<4x8x8xbf16>, vector<4x8x8xbf16>, vector<4x8x8xf32> -> vector<4x8x8xf32>
    "tpu.trace_stop"() : () -> ()
    %cst_64 = arith.constant dense<0xFF800000> : vector<4x8xf32>
    %132 = vector.multi_reduction <maximumf>, %131, %cst_64 [2] : vector<4x8x8xf32> to vector<4x8xf32>
    %133 = vector.shape_cast %132 : vector<4x8xf32> to vector<4x8x1xf32>
    %134 = vector.broadcast %133 : vector<4x8x1xf32> to vector<4x8x8xf32>
    %135 = arith.subf %131, %134 : vector<4x8x8xf32>
    %136 = math.exp %135 : vector<4x8x8xf32>
    %cst_65 = arith.constant dense<0.000000e+00> : vector<4x8xf32>
    %137 = vector.multi_reduction <add>, %136, %cst_65 [2] : vector<4x8x8xf32> to vector<4x8xf32>
    %138 = vector.shape_cast %137 : vector<4x8xf32> to vector<4x8x1xf32>
    %139 = tpu.reciprocal %138 {approx = true} : vector<4x8x1xf32> -> vector<4x8x1xf32>
    %140 = vector.broadcast %139 : vector<4x8x1xf32> to vector<4x8x8xf32>
    %141 = arith.mulf %136, %140 : vector<4x8x8xf32>
    %142 = arith.truncf %141 : vector<4x8x8xf32> to vector<4x8x8xbf16>
    %143 = arith.truncf %128 : vector<4x8x8xf32> to vector<4x8x8xbf16>
    "tpu.trace_start"() <{level = 10 : i32, message = "hqk,hkd->hqd"}> : () -> ()
    %cst_66 = arith.constant dense<0.000000e+00> : vector<4x8x8xf32>
    %144 = tpu.matmul %142, %143, %cst_66 {dimension_numbers = #tpu.dot_dimension_numbers<[2], [1], [1], [2], [0, 0, 0, 1, 1, 2], [0], [0]>} : vector<4x8x8xbf16>, vector<4x8x8xbf16>, vector<4x8x8xf32> -> vector<4x8x8xf32>
    "tpu.trace_stop"() : () -> ()
    %145 = arith.truncf %144 : vector<4x8x8xf32> to vector<4x8x8xbf16>
    "tpu.trace_start"() <{level = 10 : i32, message = "hqd,hde->hqe"}> : () -> ()
    %cst_67 = arith.constant dense<0.000000e+00> : vector<4x8x32xf32>
    %146 = tpu.matmul %145, %99, %cst_67 {dimension_numbers = #tpu.dot_dimension_numbers<[2], [1], [1], [2], [0, 0, 0, 1, 1, 2], [0], [0]>} : vector<4x8x8xbf16>, vector<4x8x32xbf16>, vector<4x8x32xf32> -> vector<4x8x32xf32>
    "tpu.trace_stop"() : () -> ()
    %cst_68 = arith.constant dense<0.000000e+00> : vector<8x32xf32>
    %147 = vector.multi_reduction <add>, %146, %cst_68 [0] : vector<4x8x32xf32> to vector<8x32xf32>
    %148 = vector.broadcast %101 : vector<1x32xf32> to vector<8x32xf32>
    %149 = arith.addf %147, %148 : vector<8x32xf32>
    %150 = arith.addf %91, %149 : vector<8x32xf32>
    %151 = vector.extract_strided_slice %8 {offsets = [1, 0, 0], sizes = [1, 1, 32], strides = [1, 1, 1]} : vector<3x2x32xf32> to vector<1x1x32xf32>
    %152 = vector.shape_cast %151 : vector<1x1x32xf32> to vector<1x32xf32>
    %153 = vector.extract_strided_slice %8 {offsets = [1, 1, 0], sizes = [1, 1, 32], strides = [1, 1, 1]} : vector<3x2x32xf32> to vector<1x1x32xf32>
    %154 = vector.shape_cast %153 : vector<1x1x32xf32> to vector<1x32xf32>
    %cst_69 = arith.constant dense<0.000000e+00> : vector<8xf32>
    %155 = vector.multi_reduction <add>, %150, %cst_69 [1] : vector<8x32xf32> to vector<8xf32>
    %156 = vector.shape_cast %155 : vector<8xf32> to vector<8x1xf32>
    %cst_70 = arith.constant 3.200000e+01 : f32
    %157 = vector.broadcast %cst_70 : f32 to vector<8x1xf32>
    %158 = arith.divf %156, %157 : vector<8x1xf32>
    %159 = vector.broadcast %158 : vector<8x1xf32> to vector<8x32xf32>
    %160 = arith.subf %150, %159 : vector<8x32xf32>
    %161 = arith.mulf %160, %160 : vector<8x32xf32>
    %cst_71 = arith.constant dense<0.000000e+00> : vector<8xf32>
    %162 = vector.multi_reduction <add>, %161, %cst_71 [1] : vector<8x32xf32> to vector<8xf32>
    %163 = vector.shape_cast %162 : vector<8xf32> to vector<8x1xf32>
    %cst_72 = arith.constant 3.200000e+01 : f32
    %164 = vector.broadcast %cst_72 : f32 to vector<8x1xf32>
    %165 = arith.divf %163, %164 : vector<8x1xf32>
    %166 = vector.broadcast %158 : vector<8x1xf32> to vector<8x32xf32>
    %167 = arith.subf %150, %166 : vector<8x32xf32>
    %cst_73 = arith.constant 9.99999974E-6 : f32
    %168 = vector.broadcast %cst_73 : f32 to vector<8x1xf32>
    %169 = arith.addf %165, %168 : vector<8x1xf32>
    %170 = math.rsqrt %169 : vector<8x1xf32>
    %171 = vector.broadcast %170 : vector<8x1xf32> to vector<8x32xf32>
    %172 = arith.mulf %167, %171 : vector<8x32xf32>
    %173 = vector.broadcast %152 : vector<1x32xf32> to vector<8x32xf32>
    %174 = arith.mulf %172, %173 : vector<8x32xf32>
    %175 = vector.broadcast %154 : vector<1x32xf32> to vector<8x32xf32>
    %176 = arith.addf %174, %175 : vector<8x32xf32>
    %c0_74 = arith.constant 0 : index
    %c0_75 = arith.constant 0 : index
    %c0_76 = arith.constant 0 : index
    %c0_77 = arith.constant 0 : index
    %177 = vector.load %arg13[%c0_74, %c0_75, %c0_76, %c0_77] : memref<1x2x32x32xbf16, #tpu.memory_space<vmem>>, vector<1x2x32x32xbf16>
    %178 = vector.shape_cast %177 : vector<1x2x32x32xbf16> to vector<2x32x32xbf16>
    %c0_78 = arith.constant 0 : index
    %c0_79 = arith.constant 0 : index
    %c0_80 = arith.constant 0 : index
    %179 = vector.load %arg14[%c0_78, %c0_79, %c0_80] : memref<1x2x32xf32, #tpu.memory_space<vmem>>, vector<1x2x32xf32>
    %180 = vector.shape_cast %179 : vector<1x2x32xf32> to vector<2x32xf32>
    %181 = arith.truncf %176 : vector<8x32xf32> to vector<8x32xbf16>
    %182 = vector.extract_strided_slice %178 {offsets = [0, 0, 0], sizes = [1, 32, 32], strides = [1, 1, 1]} : vector<2x32x32xbf16> to vector<1x32x32xbf16>
    %183 = vector.shape_cast %182 : vector<1x32x32xbf16> to vector<32x32xbf16>
    %cst_81 = arith.constant dense<0.000000e+00> : vector<8x32xf32>
    %184 = tpu.matmul %181, %183, %cst_81 {dimension_numbers = #tpu.dot_dimension_numbers<[1], [0], [0], [1], [0, 0, 1, 1], [], []>} : vector<8x32xbf16>, vector<32x32xbf16>, vector<8x32xf32> -> vector<8x32xf32>
    %185 = vector.extract_strided_slice %180 {offsets = [0, 0], sizes = [1, 32], strides = [1, 1]} : vector<2x32xf32> to vector<1x32xf32>
    %186 = vector.broadcast %185 : vector<1x32xf32> to vector<8x32xf32>
    %187 = arith.addf %184, %186 : vector<8x32xf32>
    %cst_82 = arith.constant 0.000000e+00 : f32
    %188 = vector.broadcast %cst_82 : f32 to vector<8x32xf32>
    %189 = arith.maximumf %187, %188 : vector<8x32xf32>
    %190 = arith.truncf %189 : vector<8x32xf32> to vector<8x32xbf16>
    %191 = vector.extract_strided_slice %178 {offsets = [1, 0, 0], sizes = [1, 32, 32], strides = [1, 1, 1]} : vector<2x32x32xbf16> to vector<1x32x32xbf16>
    %192 = vector.shape_cast %191 : vector<1x32x32xbf16> to vector<32x32xbf16>
    %cst_83 = arith.constant dense<0.000000e+00> : vector<8x32xf32>
    %193 = tpu.matmul %190, %192, %cst_83 {dimension_numbers = #tpu.dot_dimension_numbers<[1], [0], [0], [1], [0, 0, 1, 1], [], []>} : vector<8x32xbf16>, vector<32x32xbf16>, vector<8x32xf32> -> vector<8x32xf32>
    %194 = vector.extract_strided_slice %180 {offsets = [1, 0], sizes = [1, 32], strides = [1, 1]} : vector<2x32xf32> to vector<1x32xf32>
    %195 = vector.broadcast %194 : vector<1x32xf32> to vector<8x32xf32>
    %196 = arith.addf %193, %195 : vector<8x32xf32>
    %197 = arith.addf %176, %196 : vector<8x32xf32>
    %198 = vector.extract_strided_slice %8 {offsets = [2, 0, 0], sizes = [1, 1, 32], strides = [1, 1, 1]} : vector<3x2x32xf32> to vector<1x1x32xf32>
    %199 = vector.shape_cast %198 : vector<1x1x32xf32> to vector<1x32xf32>
    %200 = vector.extract_strided_slice %8 {offsets = [2, 1, 0], sizes = [1, 1, 32], strides = [1, 1, 1]} : vector<3x2x32xf32> to vector<1x1x32xf32>
    %201 = vector.shape_cast %200 : vector<1x1x32xf32> to vector<1x32xf32>
    %cst_84 = arith.constant dense<0.000000e+00> : vector<8xf32>
    %202 = vector.multi_reduction <add>, %197, %cst_84 [1] : vector<8x32xf32> to vector<8xf32>
    %203 = vector.shape_cast %202 : vector<8xf32> to vector<8x1xf32>
    %cst_85 = arith.constant 3.200000e+01 : f32
    %204 = vector.broadcast %cst_85 : f32 to vector<8x1xf32>
    %205 = arith.divf %203, %204 : vector<8x1xf32>
    %206 = vector.broadcast %205 : vector<8x1xf32> to vector<8x32xf32>
    %207 = arith.subf %197, %206 : vector<8x32xf32>
    %208 = arith.mulf %207, %207 : vector<8x32xf32>
    %cst_86 = arith.constant dense<0.000000e+00> : vector<8xf32>
    %209 = vector.multi_reduction <add>, %208, %cst_86 [1] : vector<8x32xf32> to vector<8xf32>
    %210 = vector.shape_cast %209 : vector<8xf32> to vector<8x1xf32>
    %cst_87 = arith.constant 3.200000e+01 : f32
    %211 = vector.broadcast %cst_87 : f32 to vector<8x1xf32>
    %212 = arith.divf %210, %211 : vector<8x1xf32>
    %213 = vector.broadcast %205 : vector<8x1xf32> to vector<8x32xf32>
    %214 = arith.subf %197, %213 : vector<8x32xf32>
    %cst_88 = arith.constant 9.99999974E-6 : f32
    %215 = vector.broadcast %cst_88 : f32 to vector<8x1xf32>
    %216 = arith.addf %212, %215 : vector<8x1xf32>
    %217 = math.rsqrt %216 : vector<8x1xf32>
    %218 = vector.broadcast %217 : vector<8x1xf32> to vector<8x32xf32>
    %219 = arith.mulf %214, %218 : vector<8x32xf32>
    %220 = vector.broadcast %199 : vector<1x32xf32> to vector<8x32xf32>
    %221 = arith.mulf %219, %220 : vector<8x32xf32>
    %222 = vector.broadcast %201 : vector<1x32xf32> to vector<8x32xf32>
    %223 = arith.addf %221, %222 : vector<8x32xf32>
    %c0_89 = arith.constant 0 : index
    %c0_90 = arith.constant 0 : index
    %c0_91 = arith.constant 0 : index
    %224 = vector.load %arg18[%c0_89, %c0_90, %c0_91] : memref<1x8x32xf32, #tpu.memory_space<vmem>>, vector<1x8x32xf32>
    %225 = vector.shape_cast %224 : vector<1x8x32xf32> to vector<8x32xf32>
    %226 = vector.shape_cast %223 : vector<8x32xf32> to vector<1x8x32xf32>
    tpu.vector_store %arg18[%c0_89, %c0_90, %c0_91], %226 {strides = array<i32>} : memref<1x8x32xf32, #tpu.memory_space<vmem>>, vector<1x8x32xf32>,
    %c1_i32 = arith.constant 1 : i32
    %227 = arith.cmpi eq, %arg1, %c1_i32 : i32
    %228 = arith.extui %227 : i1 to i32
    %c0_i32_92 = arith.constant 0 : i32
    %229 = arith.cmpi ne, %228, %c0_i32_92 : i32
    scf.if %229 {
      %c0_93 = arith.constant 0 : index
      %c0_94 = arith.constant 0 : index
      %230 = vector.load %arg16[%c0_93, %c0_94] : memref<32x32xbf16, #tpu.memory_space<vmem>>, vector<32x32xbf16>
      %231 = arith.truncf %223 : vector<8x32xf32> to vector<8x32xbf16>
      %cst_95 = arith.constant dense<0.000000e+00> : vector<8x32xf32>
      %232 = tpu.matmul %231, %230, %cst_95 {dimension_numbers = #tpu.dot_dimension_numbers<[1], [0], [0], [1], [0, 0, 1, 1], [], []>} : vector<8x32xbf16>, vector<32x32xbf16>, vector<8x32xf32> -> vector<8x32xf32>
      %c0_96 = arith.constant 0 : index
      %c0_97 = arith.constant 0 : index
      %233 = vector.load %arg17[%c0_96, %c0_97] : memref<1x32xf32, #tpu.memory_space<vmem>>, vector<1x32xf32>
      %234 = vector.broadcast %233 : vector<1x32xf32> to vector<8x32xf32>
      %235 = arith.addf %232, %234 : vector<8x32xf32>
      %cst_98 = arith.constant dense<0xFF800000> : vector<8xf32>
      %236 = vector.multi_reduction <maximumf>, %235, %cst_98 [1] : vector<8x32xf32> to vector<8xf32>
      %237 = vector.shape_cast %236 : vector<8xf32> to vector<8x1xf32>
      %238 = vector.broadcast %237 : vector<8x1xf32> to vector<8x32xf32>
      %239 = arith.subf %235, %238 : vector<8x32xf32>
      %240 = math.exp %239 : vector<8x32xf32>
      %cst_99 = arith.constant dense<0.000000e+00> : vector<8xf32>
      %241 = vector.multi_reduction <add>, %240, %cst_99 [1] : vector<8x32xf32> to vector<8xf32>
      %242 = vector.shape_cast %241 : vector<8xf32> to vector<8x1xf32>
      %243 = vector.broadcast %242 : vector<8x1xf32> to vector<8x32xf32>
      %244 = arith.divf %240, %243 : vector<8x32xf32>
      %c0_100 = arith.constant 0 : index
      %c0_101 = arith.constant 0 : index
      %c0_102 = arith.constant 0 : index
      %245 = vector.load %arg18[%c0_100, %c0_101, %c0_102] : memref<1x8x32xf32, #tpu.memory_space<vmem>>, vector<1x8x32xf32>
      %246 = vector.shape_cast %245 : vector<1x8x32xf32> to vector<8x32xf32>
      %247 = vector.shape_cast %244 : vector<8x32xf32> to vector<1x8x32xf32>
      tpu.vector_store %arg18[%c0_100, %c0_101, %c0_102], %247 {strides = array<i32>} : memref<1x8x32xf32, #tpu.memory_space<vmem>>, vector<1x8x32xf32>,
    } else {
    }
    return
  }
  func.func @transform_0(%arg0: i32, %arg1: i32) -> (i32, i32, i32) {
    %c0_i32 = arith.constant 0 : i32
    %c0_i32_0 = arith.constant 0 : i32
    %c0_i32_1 = arith.constant 0 : i32
    return %arg0, %c0_i32, %c0_i32_0 : i32, i32, i32
  }
  func.func @transform_1(%arg0: i32, %arg1: i32) -> (i32, i32, i32) {
    %c0_i32 = arith.constant 0 : i32
    %c0_i32_0 = arith.constant 0 : i32
    %c0_i32_1 = arith.constant 0 : i32
    return %arg0, %c0_i32, %c0_i32_0 : i32, i32, i32
  }
  func.func @transform_2(%arg0: i32, %arg1: i32) -> (i32, i32, i32) {
    %c0_i32 = arith.constant 0 : i32
    %c0_i32_0 = arith.constant 0 : i32
    %c0_i32_1 = arith.constant 0 : i32
    %c0_i32_2 = arith.constant 0 : i32
    return %c0_i32, %c0_i32_0, %c0_i32_1 : i32, i32, i32
  }
  func.func @transform_3(%arg0: i32, %arg1: i32) -> (i32, i32, i32, i32, i32) {
    %c0_i32 = arith.constant 0 : i32
    %c0_i32_0 = arith.constant 0 : i32
    %c0_i32_1 = arith.constant 0 : i32
    %c0_i32_2 = arith.constant 0 : i32
    %c0_i32_3 = arith.constant 0 : i32
    return %arg1, %c0_i32, %c0_i32_0, %c0_i32_1, %c0_i32_2 : i32, i32, i32, i32, i32
  }
  func.func @transform_4(%arg0: i32, %arg1: i32) -> (i32, i32, i32, i32, i32) {
    %c0_i32 = arith.constant 0 : i32
    %c0_i32_0 = arith.constant 0 : i32
    %c0_i32_1 = arith.constant 0 : i32
    %c0_i32_2 = arith.constant 0 : i32
    %c0_i32_3 = arith.constant 0 : i32
    return %arg1, %c0_i32, %c0_i32_0, %c0_i32_1, %c0_i32_2 : i32, i32, i32, i32, i32
  }
  func.func @transform_5(%arg0: i32, %arg1: i32) -> (i32, i32, i32, i32) {
    %c0_i32 = arith.constant 0 : i32
    %c0_i32_0 = arith.constant 0 : i32
    %c0_i32_1 = arith.constant 0 : i32
    %c0_i32_2 = arith.constant 0 : i32
    return %arg1, %c0_i32, %c0_i32_0, %c0_i32_1 : i32, i32, i32, i32
  }
  func.func @transform_6(%arg0: i32, %arg1: i32) -> (i32, i32, i32) {
    %c0_i32 = arith.constant 0 : i32
    %c0_i32_0 = arith.constant 0 : i32
    %c0_i32_1 = arith.constant 0 : i32
    return %arg1, %c0_i32, %c0_i32_0 : i32, i32, i32
  }
  func.func @transform_7(%arg0: i32, %arg1: i32) -> (i32, i32, i32, i32, i32) {
    %c0_i32 = arith.constant 0 : i32
    %c0_i32_0 = arith.constant 0 : i32
    %c0_i32_1 = arith.constant 0 : i32
    %c0_i32_2 = arith.constant 0 : i32
    %c0_i32_3 = arith.constant 0 : i32
    return %arg1, %c0_i32, %c0_i32_0, %c0_i32_1, %c0_i32_2 : i32, i32, i32, i32, i32
  }
  func.func @transform_8(%arg0: i32, %arg1: i32) -> (i32, i32, i32, i32, i32) {
    %c0_i32 = arith.constant 0 : i32
    %c0_i32_0 = arith.constant 0 : i32
    %c0_i32_1 = arith.constant 0 : i32
    %c0_i32_2 = arith.constant 0 : i32
    %c0_i32_3 = arith.constant 0 : i32
    return %arg1, %c0_i32, %c0_i32_0, %c0_i32_1, %c0_i32_2 : i32, i32, i32, i32, i32
  }
  func.func @transform_9(%arg0: i32, %arg1: i32) -> (i32, i32, i32, i32) {
    %c0_i32 = arith.constant 0 : i32
    %c0_i32_0 = arith.constant 0 : i32
    %c0_i32_1 = arith.constant 0 : i32
    %c0_i32_2 = arith.constant 0 : i32
    return %arg1, %c0_i32, %c0_i32_0, %c0_i32_1 : i32, i32, i32, i32
  }
  func.func @transform_10(%arg0: i32, %arg1: i32) -> (i32, i32, i32) {
    %c0_i32 = arith.constant 0 : i32
    %c0_i32_0 = arith.constant 0 : i32
    %c0_i32_1 = arith.constant 0 : i32
    return %arg1, %c0_i32, %c0_i32_0 : i32, i32, i32
  }
  func.func @transform_11(%arg0: i32, %arg1: i32) -> (i32, i32, i32, i32) {
    %c0_i32 = arith.constant 0 : i32
    %c0_i32_0 = arith.constant 0 : i32
    %c0_i32_1 = arith.constant 0 : i32
    %c0_i32_2 = arith.constant 0 : i32
    return %arg1, %c0_i32, %c0_i32_0, %c0_i32_1 : i32, i32, i32, i32
  }
  func.func @transform_12(%arg0: i32, %arg1: i32) -> (i32, i32, i32) {
    %c0_i32 = arith.constant 0 : i32
    %c0_i32_0 = arith.constant 0 : i32
    %c0_i32_1 = arith.constant 0 : i32
    return %arg1, %c0_i32, %c0_i32_0 : i32, i32, i32
  }
  func.func @transform_13(%arg0: i32, %arg1: i32) -> (i32, i32, i32, i32) {
    %c0_i32 = arith.constant 0 : i32
    %c0_i32_0 = arith.constant 0 : i32
    %c0_i32_1 = arith.constant 0 : i32
    %c0_i32_2 = arith.constant 0 : i32
    return %arg1, %c0_i32, %c0_i32_0, %c0_i32_1 : i32, i32, i32, i32
  }
  func.func @transform_14(%arg0: i32, %arg1: i32) -> (i32, i32) {
    %c0_i32 = arith.constant 0 : i32
    %c0_i32_0 = arith.constant 0 : i32
    %c0_i32_1 = arith.constant 0 : i32
    return %c0_i32, %c0_i32_0 : i32, i32
  }
  func.func @transform_15(%arg0: i32, %arg1: i32) -> (i32, i32) {
    %c0_i32 = arith.constant 0 : i32
    %c0_i32_0 = arith.constant 0 : i32
    %c0_i32_1 = arith.constant 0 : i32
    return %c0_i32, %c0_i32_0 : i32, i32
  }
  func.func @transform_16(%arg0: i32, %arg1: i32) -> (i32, i32, i32) {
    %c0_i32 = arith.constant 0 : i32
    %c0_i32_0 = arith.constant 0 : i32
    %c0_i32_1 = arith.constant 0 : i32
    return %arg0, %c0_i32, %c0_i32_0 : i32, i32, i32
  }
}

</mosaic_0001>

<bundles_post_ra>
// kernel: tpu_custom_call.1
= control target key start
LH: loop header
LB: loop body
LE: loop exit
PB: predicated region body
PF: predicated region fallthrough
CT: control target
= control target key end

     0   :  { %s5724_s0 = inlined_call_operand.vmem [shape: f32[2,8,32], index: 0, kind: input, shape index: {}]   ;;  %s5725_s1 = inlined_call_operand.vmem [shape: f32[2,8,32], index: 1, kind: input, shape index: {}]   ;;  %s5726_s2 = inlined_call_operand.vmem [shape: f32[1,8,8], index: 2, kind: input, shape index: {}]   ;;  %s5727_s3 = inlined_call_operand.vmem [shape: bf16[2,3,4,32,8], index: 3, kind: input, shape index: {}]   ;;  %s5728_s4 = inlined_call_operand.vmem [shape: f32[2,3,4,1,8], index: 4, kind: input, shape index: {}]   ;;  %s5729_s5 = inlined_call_operand.vmem [shape: bf16[2,4,8,32], index: 5, kind: input, shape index: {}]   ;;  %s5730_s6 = inlined_call_operand.vmem [shape: f32[2,1,32], index: 6, kind: input, shape index: {}]   ;;  %s5731_s7 = inlined_call_operand.vmem [shape: bf16[2,3,4,32,8], index: 7, kind: input, shape index: {}]   ;;  %s5732_s8 = inlined_call_operand.vmem [shape: f32[2,3,4,1,8], index: 8, kind: input, shape index: {}]   ;;  %s5733_s9 = inlined_call_operand.vmem [shape: bf16[2,4,8,32], index: 9, kind: input, shape index: {}]   ;;  %s5734_s10 = inlined_call_operand.vmem [shape: f32[2,1,32], index: 10, kind: input, shape index: {}]   ;;  %s5735_s11 = inlined_call_operand.vmem [shape: bf16[2,2,32,32], index: 11, kind: input, shape index: {}]   ;;  %s5736_s12 = inlined_call_operand.vmem [shape: f32[2,2,32], index: 12, kind: input, shape index: {}]   ;;  %s5737_s13 = inlined_call_operand.vmem [shape: f32[2,3,2,32], index: 13, kind: input, shape index: {}]   ;;  %s5738_s14 = inlined_call_operand.vmem [shape: bf16[32,32], index: 14, kind: input, shape index: {}]   ;;  %s5739_s15 = inlined_call_operand.vmem [shape: f32[1,32], index: 15, kind: input, shape index: {}]   ;;  %s5740_s16 = inlined_call_operand.hbm [shape: f32[2,8,32], index: 16, kind: output, shape index: {}]  }
   0x1   :  { %5757 = sst [smem:[#allocation19_spill]] %s5724_s0 }
   0x2   :  { %5758 = sst [smem:[#allocation20_spill]] %s5725_s1 }
   0x3   :  { %5759 = sst [smem:[#allocation21_spill]] %s5726_s2 }
   0x4   :  { %5760 = sst [smem:[#allocation22_spill]] %s5727_s3 }
   0x5   :  { %5761 = sst [smem:[#allocation23_spill]] %s5728_s4 }
   0x6   :  { %5762 = sst [smem:[#allocation24_spill]] %s5729_s5 }
   0x7   :  { %5763 = sst [smem:[#allocation25_spill]] %s5730_s6 }
   0x8   :  { %5764 = sst [smem:[#allocation26_spill]] %s5738_s14 }
   0x9   :  { %5765 = sst [smem:[#allocation27_spill]] %s5739_s15 }
   0xa   :  { %5766 = sst [smem:[#allocation28_spill]] %s5740_s16 }
   0xb   :  { %21 = vsyncpa [#allocation3], 0 }
   0xc   :  { %23 = vsyncpa [#allocation3 + $0x1], 0  ;;  %s5073_s21 = smov 0   ;;  %s5075_s22 = smov 0  }
   0xd   :  { %s5077_s23 = smov 0   ;;  %s5079_s24 = smov 0  }
   0xe   :  { %s5081_s25 = smov 0   ;;  %s5083_s26 = smov 0  }
   0xf   :  { %s5085_s27 = smov 0   ;;  %s5087_s28 = smov 0  }
  0x10 LB: > { %5767 = sst [smem:[#allocation5_spill]] %s4953_s21  ;;  %s4065_s29 = sadd.s32 4294967295, %s4981_s28   ;;  %s4981_s28 = sphi %s5087_s28, %s29_s28   ;;  %s4977_s27 = sphi %s5085_s27, %s5812_s27   ;;  %s4973_s26 = sphi %s5083_s26, %s5811_s26   ;;  %s4969_s25 = sphi %s5081_s25, %s5810_s25   ;;  %s4965_s24 = sphi %s5079_s24, %s5809_s24   ;;  %s4961_s23 = sphi %s5077_s23, %s5808_s23   ;;  %s4957_s22 = sphi %s5075_s22, %s5807_s22   ;;  %s4953_s21 = sphi %s5073_s21, %s5806_s21  }
  0x11   : > { %5768 = sst [smem:[#allocation6_spill]] %s4957_s22  ;;  %s4066_s30 = sadd.s32 4294967294, %s4981_s28  }
  0x12   : > { %5769 = sst [smem:[#allocation7_spill]] %s4961_s23  ;;  %s38_s0 = sadd.s32 1, %s4973_s26 }
  0x13   : > { %5770 = sst [smem:[#allocation8_spill]] %s4965_s24  ;;  %p39_p0 = scmp.ge.s32.totalorder %s38_s0, 2 }
  0x14   : > { %5771 = sst [smem:[#allocation9_spill]] %s4969_s25  ;;  %s41_s17 = sadd.s32 1, %s4977_s27 }
  0x15   : > { %5772 = sst [smem:[#allocation10_spill]] %s4973_s26  ;;  %p459_p1 = scmp.ne.s32.totalorder %s4961_s23, %s4957_s22 }
  0x16   : > { %5773 = sst [smem:[#allocation11_spill]] %s4977_s27  ;;  %p460_p2 = scmp.eq.s32.totalorder %s4065_s29, 3 }
  0x17   : > { %5774 = sst [smem:[#allocation12_spill]] %s4981_s28  ;;  %s5814_s0 = smov (%p39_p0, %s38_s0), 0 }
  0x18   : > { %5775 = sst [smem:[#allocation13_spill]] %s5814_s0  ;;  %s5816_s17 = smov (!%p39_p0, %s41_s17), %s4977_s27 }
  0x19   : > { %p5122_p3 = por %p460_p2, %p459_p1  ;;  %p465_p4 = scmp.ne.s32.totalorder %s4957_s22, %s4953_s21 }
  0x1a   : > { %p43_p5 = scmp.ge.s32.totalorder %s5816_s17, 2  ;;  %p466_p6 = scmp.eq.s32.totalorder %s4066_s30, 3 }
  0x1b   : > { %s5776_s18 = scalar_select %p5122_p3, 1, 0 }
  0x1c   : > { %p4069_p7 = scmp.ge.s32.totalorder %s4981_s28, 1  ;;  %p588_p8 = scmp.lt.s32.totalorder %s4981_s28, 5 }
  0x1d   : > { %5777 = sst [smem:[#allocation14_spill]] %s5776_s18  ;;  %s5818_s17 = smov (%p43_p5, %s5816_s17), 0 }
  0x1e   : > { %5778 = sst [smem:[#allocation15_spill]] %s5818_s17  ;;  %p5132_p9 = por %p466_p6, %p465_p4 }
  0x1f   : > { %p589_p10 = pnand %p4069_p7, %p588_p8  ;;  %s446_s20 = ssub.s32 %s4977_s27, %s5818_s17 }
  0x20   : > { %s5779_s19 = scalar_select %p5132_p9, 1, 0 }
  0x21   : > { %s449_s29 = sadd.s32 1, %s4961_s23  ;;  %p447_p11 = scmp.eq.s32.totalorder %s446_s20, 0 }
  0x22   : > { %5780 = sst [smem:[#allocation16_spill]] %s5779_s19  ;;  %592 = sbr.rel (%p589_p10) target bundleno = 4442 (0x115a), region = 84 }
  0x23   : > { %s5140_s0 = scalar_select %p447_p11, %s4961_s23, %s449_s29  }
  0x25   : > { %5781 = sst [smem:[#allocation17_spill]] %s5140_s0 }
  0x29   : > { %s5749_s30 = sand.u32 1, %s4957_s22   ;;  %p689_p12 = scmp.lt.s32.totalorder %s4969_s25, 1 }
  0x2a   : > { %s4070_s26 = sshll.u32 %s5749_s30, 3  ;;  %p697_p13 = scmp.lt.s32.totalorder %s4965_s24, 1 }
  0x2b   : > { %s690_s21 = scalar_select %p689_p12, %s4969_s25, 1 }
  0x2c   : > { %s5149_s19 = scalar_select %p697_p13, %s4965_s24, 1 }
  0x2d   : > { %s4071_s20 = sshll.u32 %s690_s21, 3  ;;  %s5782_s27 = sld [smem:[#allocation19_spill]] }
  0x2e   : > { %s5783_s1 = sld [smem:[#allocation20_spill]]  ;;  %s4713_s16 = smul.u32 192, %s5149_s19 }
  0x2f   : > { %s4221_s18 = sshll.u32 %s5149_s19, 4  ;;  %s4714_s22 = smul.u32 12, %s5149_s19 }
  0x30   : > { %s5785_s5 = sld [smem:[#allocation24_spill]]  ;;  %s5786_s3 = sld [smem:[#allocation22_spill]] }
  0x31   : > { %s5788_s4 = sld [smem:[#allocation23_spill]]  ;;  %s5184_s15 = scalar_lea.vmem %s5731_s7, %s4713_s16 }
  0x32   : > { %s5189_s2 = scalar_lea.vmem %s5732_s8, %s4714_s22  ;;  %s730_s28 = scalar_lea.vmem %s5734_s10, %s5149_s19 }
  0x33   : > { %s692_s0 = scalar_lea.vmem %s5782_s27, %s4071_s20  ;;  %s5194_s27 = scalar_lea.vmem %s5733_s9, %s4221_s18 }
  0x34   : > { %s5157_s30 = scalar_lea.vmem %s5783_s1, %s4071_s20  ;;  %s4223_s20 = sshll.u32 %s5149_s19, 5 }
  0x35   : > { %5784 = sst [smem:[#allocation18_spill]] %s5157_s30  ;;  %s4081_s24 = sshll.u32 %s5149_s19, 1 }
  0x36   : > { %s5165_s14 = scalar_lea.vmem %s5785_s5, %s4221_s18  ;;  %s5170_s17 = scalar_lea.vmem %s5786_s3, %s4713_s16 }
  0x37   : > { %s5179_s1 = scalar_lea.vmem %s5788_s4, %s4714_s22  ;;  %s5204_s16 = scalar_lea.vmem %s5735_s11, %s4223_s20 }
  0x38   : > { %s5210_s22 = scalar_lea.vmem %s5736_s12, %s4081_s24  ;;  %s4715_s25 = smul.u32 6, %s5149_s19 }
  0x39   : > { %s5218_s23 = scalar_lea.vmem [#allocation2], %s4070_s26  ;;  %s5789_s29 = sld [smem:[#allocation8_spill]] }
  0x3a   : > { %s5216_s21 = scalar_lea.vmem %s5737_s13, %s4715_s25 }
  0x3f   : > { %p4083_p0 = scmp.ne.s32.totalorder %s5789_s29, 0 }
  0x40   : > { %v750_v0 = vld [vmem:[%s692_s0] sm:$0xff] (!%p4083_p0)  ;;  %vm751_vm0 = vcmask (!%p4083_p0), 261120  }
  0x41   : > { %749 = sbr.rel (%p4083_p0) target bundleno = 72 (0x48), region = 88  ;;  %752 = vst.msk [vmem:[%s5218_s23] sm:$0xff] (!%p4083_p0), %vm751_vm0, %v750_v0 }
  0x48 PF: > { %v4791_v1 = vld [vmem:[%s5170_s17] sm:$0xff]   ;;  %v4983_v2 = vmov 0.0   ;;  %v4792_v3 = vld [vmem:[%s5170_s17 + $0x10] sm:$0xff]   ;;  %v4793_v4 = vld [vmem:[%s5170_s17 + $0x8] sm:$0xff]   ;;  %vm4984_vm1 = vmmov 0   ;;  %vm860_vm2 = vcmask 261120  }
  0x49   : > { %4353 = vmatprep.subr.bf16.mxu0 %v4983_v2  ;;  %4361 = vmatprep.subr.bf16.mxu1 %v4983_v2  ;;  %v4794_v5 = vld [vmem:[%s5170_s17 + $0x18] sm:$0xff]   ;;  %v5235_v6 = vld [vmem:[%s5218_s23] sm:$0xff]  ;;  %v4796_v9 = vld [vmem:[%s5170_s17 + $0x30] sm:$0xff]   ;;  %vm1532_vm3 = vcmask 64512   ;;  %vm1772_vm4 = vcmask 1043456   ;;  %s5790_s26 = sld [smem:[#allocation21_spill]] }
  0x4a   : > { %4354 = vmatpush3.bf16.msra.mxu0 %v4791_v1  ;;  %4357 = vmatprep.mubr.msk.bf16.mxu0 %vm4984_vm1, %v4983_v2  ;;  %v5239_v7 = vpack.c.bf16 %v5235_v6, %v5235_v6  ;;  %v4795_v8 = vld [vmem:[%s5170_s17 + $0x20] sm:$0xff]   ;;  %v4797_v10 = vld [vmem:[%s5170_s17 + $0x28] sm:$0xff]   ;;  %v4798_v11 = vld [vmem:[%s5170_s17 + $0x38] sm:$0xff]   ;;  %s5791_s0 = sld [smem:[#allocation25_spill]]  ;;  %s5793_s20 = sld [smem:[#allocation18_spill]] }
  0x4b   : > { %4362 = vmatpush3.bf16.msra.mxu1 %v4792_v3  ;;  %4355 = vmatprep.subr.bf16.mxu0 %v4983_v2  ;;  %v4799_v12 = vld [vmem:[%s5170_s17 + $0x40] sm:$0xff]   ;;  %v4800_v13 = vld [vmem:[%s5170_s17 + $0x50] sm:$0xff]   ;;  %v4801_v14 = vld [vmem:[%s5170_s17 + $0x48] sm:$0xff]  }
  0x4c   : > { %4363 = vmatprep.subr.bf16.mxu1 %v4983_v2  ;;  %4365 = vmatprep.mubr.msk.bf16.mxu1 %vm4984_vm1, %v4983_v2  ;;  %v4802_v15 = vld [vmem:[%s5170_s17 + $0x58] sm:$0xff]   ;;  %v4803_v16 = vld [vmem:[%s5170_s17 + $0x60] sm:$0xff]   ;;  %v4804_v17 = vld [vmem:[%s5170_s17 + $0x70] sm:$0xff]  }
  0x4d   : > { %v4805_v18 = vld [vmem:[%s5170_s17 + $0x68] sm:$0xff]   ;;  %v4806_v19 = vld [vmem:[%s5170_s17 + $0x78] sm:$0xff]   ;;  %v4807_v20 = vld [vmem:[%s5170_s17 + $0x80] sm:$0xff]  }
  0x4e   : > { %4356 = vmatpush3.bf16.msra.mxu0 %v4793_v4  ;;  %v4808_v21 = vld [vmem:[%s5170_s17 + $0x90] sm:$0xff]   ;;  %v4809_v22 = vld [vmem:[%s5170_s17 + $0x88] sm:$0xff]   ;;  %v4810_v23 = vld [vmem:[%s5170_s17 + $0x98] sm:$0xff]  }
  0x4f   : > { %4364 = vmatpush3.bf16.msra.mxu1 %v4794_v5  ;;  %4369 = vmatprep.subr.bf16.mxu0 %v4983_v2  ;;  %v4811_v24 = vld [vmem:[%s5170_s17 + $0xa0] sm:$0xff]   ;;  %v4812_v25 = vld [vmem:[%s5170_s17 + $0xb0] sm:$0xff]   ;;  %v4813_v26 = vld [vmem:[%s5170_s17 + $0xa8] sm:$0xff]  }
  0x50   : > { %4377 = vmatprep.subr.bf16.mxu1 %v4983_v2  ;;  %v4814_v27 = vld [vmem:[%s5170_s17 + $0xb8] sm:$0xff]   ;;  %v4100_v44 = vld [vmem:[%s5179_s1 + $0x4] ss:$0 sm:$0xff]  ;;  %v4101_v45 = vld [vmem:[%s5179_s1 + $0x5] ss:$0 sm:$0xff]  ;;  %s5792_s17 = scalar_lea.vmem %s5791_s0, %s5149_s19  ;;  %s5794_s19 = sld [smem:[#allocation8_spill]] }
  0x51   : > { %4358 = vmatmul.mubr.msk.bf16.vlgmr.msra.gmra.mrb[0].mxu0 %vm860_vm2, %v5239_v7  ;;  %v4084_v56 = vld [vmem:[%s5179_s1] ss:$0 sm:$0xff]  ;;  %v4085_v59 = vld [vmem:[%s5179_s1 + $0x1] ss:$0 sm:$0xff]  ;;  %v4102_v62 = vld [vmem:[%s5179_s1 + $0x6] ss:$0 sm:$0xff] }
  0x52   : > { %4366 = vmatmul.mubr.msk.bf16.vlgmr.msra.gmra.mrb[0].mxu1 %vm860_vm2, %v5239_v7  ;;  %4370 = vmatpush3.bf16.msra.mxu0 %v4795_v8  ;;  %v4103_v0 = vld [vmem:[%s5179_s1 + $0x7] ss:$0 sm:$0xff] }
  0x53   : > { %4378 = vmatpush3.bf16.msra.mxu1 %v4796_v9  ;;  %4371 = vmatprep.subr.bf16.mxu0 %v4983_v2 }
  0x54   : > { %4379 = vmatprep.subr.bf16.mxu1 %v4983_v2  ;;  %4373 = vmatprep.mubr.msk.bf16.mxu0 %vm4984_vm1, %v4983_v2 }
  0x55   : > { %4381 = vmatprep.mubr.msk.bf16.mxu1 %vm4984_vm1, %v4983_v2 }
  0x56   : > { %4372 = vmatpush3.bf16.msra.mxu0 %v4797_v10  ;;  %p4212_p1 = scmp.ne.s32.totalorder %s5794_s19, 1 }
  0x57   : > { %4380 = vmatpush3.bf16.msra.mxu1 %v4798_v11  ;;  %4385 = vmatprep.subr.bf16.mxu0 %v4983_v2  ;;  %vm4986_vm5 = vmmov (!%p4212_p1), 0   ;;  %s5796_s25 = sld [smem:[#allocation27_spill]] (!%p4212_p1) }
  0x58   : > { %4393 = vmatprep.subr.bf16.mxu1 %v4983_v2 }
  0x59   : > { %4374 = vmatmul.mubr.msk.bf16.vlgmr.msra.gmra.mrb[4].mxu0 %vm860_vm2, %v5239_v7 }
  0x5a   : > { %4382 = vmatmul.mubr.msk.bf16.vlgmr.msra.gmra.mrb[4].mxu1 %vm860_vm2, %v5239_v7  ;;  %4386 = vmatpush3.bf16.msra.mxu0 %v4799_v12 }
  0x5b   : > { %4394 = vmatpush3.bf16.msra.mxu1 %v4800_v13  ;;  %4387 = vmatprep.subr.bf16.mxu0 %v4983_v2 }
  0x5c   : > { %4395 = vmatprep.subr.bf16.mxu1 %v4983_v2  ;;  %4389 = vmatprep.mubr.msk.bf16.mxu0 %vm4984_vm1, %v4983_v2 }
  0x5d   : > { %4397 = vmatprep.mubr.msk.bf16.mxu1 %vm4984_vm1, %v4983_v2 }
  0x5e   : > { %4388 = vmatpush3.bf16.msra.mxu0 %v4801_v14 }
  0x5f   : > { %4396 = vmatpush3.bf16.msra.mxu1 %v4802_v15  ;;  %4401 = vmatprep.subr.bf16.mxu0 %v4983_v2 }
  0x60   : > { %4409 = vmatprep.subr.bf16.mxu1 %v4983_v2 }
  0x61   : > { %4390 = vmatmul.mubr.msk.bf16.vlgmr.msra.gmra.mrb[8].mxu0 %vm860_vm2, %v5239_v7 }
  0x62   : > { %4398 = vmatmul.mubr.msk.bf16.vlgmr.msra.gmra.mrb[8].mxu1 %vm860_vm2, %v5239_v7  ;;  %4402 = vmatpush3.bf16.msra.mxu0 %v4803_v16  ;;  %v4086_v16 = vld [vmem:[%s5179_s1 + $0x2] ss:$0 sm:$0xff] }
  0x63   : > { %4410 = vmatpush3.bf16.msra.mxu1 %v4804_v17  ;;  %4403 = vmatprep.subr.bf16.mxu0 %v4983_v2 }
  0x64   : > { %4411 = vmatprep.subr.bf16.mxu1 %v4983_v2  ;;  %4405 = vmatprep.mubr.msk.bf16.mxu0 %vm4984_vm1, %v4983_v2 }
  0x65   : > { %4413 = vmatprep.mubr.msk.bf16.mxu1 %vm4984_vm1, %v4983_v2 }
  0x66   : > { %4404 = vmatpush3.bf16.msra.mxu0 %v4805_v18 }
  0x67   : > { %4412 = vmatpush3.bf16.msra.mxu1 %v4806_v19  ;;  %4417 = vmatprep.subr.bf16.mxu0 %v4983_v2  ;;  %v4087_v19 = vld [vmem:[%s5179_s1 + $0x3] ss:$0 sm:$0xff] }
  0x68   : > { %4425 = vmatprep.subr.bf16.mxu1 %v4983_v2 }
  0x69   : > { %4406 = vmatmul.mubr.msk.bf16.vlgmr.msra.gmra.mrb[12].mxu0 %vm860_vm2, %v5239_v7 }
  0x6a   : > { %4414 = vmatmul.mubr.msk.bf16.vlgmr.msra.gmra.mrb[12].mxu1 %vm860_vm2, %v5239_v7  ;;  %4418 = vmatpush3.bf16.msra.mxu0 %v4807_v20 }
  0x6b   : > { %4419 = vmatprep.subr.bf16.mxu0 %v4983_v2  ;;  %4421 = vmatprep.mubr.msk.bf16.mxu0 %vm4984_vm1, %v4983_v2 }
  0x6c   : > { %4429 = vmatprep.mubr.msk.bf16.mxu1 %vm4984_vm1, %v4983_v2  ;;  %4426 = vmatpush3.bf16.msra.mxu1 %v4808_v21 }
  0x6d   : > { %4427 = vmatprep.subr.bf16.mxu1 %v4983_v2 }
  0x6e   : > { %4420 = vmatpush3.bf16.msra.mxu0 %v4809_v22 }
  0x6f   : > { %4433 = vmatprep.subr.bf16.mxu0 %v4983_v2 }
  0x70   : > { %4428 = vmatpush3.bf16.msra.mxu1 %v4810_v23 }
  0x71   : > { %4422 = vmatmul.mubr.msk.bf16.vlgmr.msra.gmra.mrb[16].mxu0 %vm860_vm2, %v5239_v7  ;;  %4441 = vmatprep.subr.bf16.mxu1 %v4983_v2 }
  0x72   : > { %4437 = vmatprep.mubr.msk.bf16.mxu0 %vm4984_vm1, %v4983_v2  ;;  %4434 = vmatpush3.bf16.msra.mxu0 %v4811_v24 }
  0x73   : > { %4430 = vmatmul.mubr.msk.bf16.vlgmr.msra.gmra.mrb[16].mxu1 %vm860_vm2, %v5239_v7  ;;  %4435 = vmatprep.subr.bf16.mxu0 %v4983_v2 }
  0x74   : > { %4442 = vmatpush3.bf16.msra.mxu1 %v4812_v25  ;;  %4445 = vmatprep.mubr.msk.bf16.mxu1 %vm4984_vm1, %v4983_v2 }
  0x75   : > { %4443 = vmatprep.subr.bf16.mxu1 %v4983_v2 }
  0x76   : > { %4436 = vmatpush3.bf16.msra.mxu0 %v4813_v26  ;;  %v4116_v26 = vld [vmem:[%s5179_s1 + $0x8] ss:$0 sm:$0xff] }
  0x77   : > { %4449 = vmatprep.subr.bf16.mxu0 %v4983_v2 }
  0x78   : > { %4444 = vmatpush3.bf16.msra.mxu1 %v4814_v27 }
  0x79   : > { %4455 = vmatprep.subr.bf16.mxu1 %v4983_v2  ;;  %4438 = vmatmul.mubr.msk.bf16.vlgmr.msra.gmra.mrb[20].mxu0 %vm860_vm2, %v5239_v7 }
  0x7a   : > { %4451 = vmatprep.mubr.msk.bf16.mxu0 %vm4984_vm1, %v4983_v2 }
  0x7b   : > { %4446 = vmatmul.mubr.msk.bf16.vlgmr.msra.gmra.mrb[20].mxu1 %vm860_vm2, %v5239_v7 }
  0x7c   : > { %4457 = vmatprep.mubr.msk.bf16.mxu1 %vm4984_vm1, %v4983_v2 }
 0x124   : > { %v898_v28 = vpop.f32.mrb[0].mxu0 }
 0x125   : > { %v4359_v29 = vpop.f32.mrb[1].mxu0  ;;  %v950_v30 = vpop.f32.mrb[0].mxu1  ;;  %v899_v63 = vadd.f32 %v4084_v56, %v898_v28  ;;  %v4117_v28 = vld [vmem:[%s5179_s1 + $0x9] ss:$0 sm:$0xff] }
 0x126   : > { %v901_v31 = vpop.f32.mrb[2].mxu0  ;;  %v4367_v32 = vpop.f32.mrb[1].mxu1  ;;  %v951_v1 = vadd.f32 %v4085_v59, %v950_v30 }
 0x127   : > { %v4360_v33 = vpop.f32.mrb[3].mxu0  ;;  %v953_v34 = vpop.f32.mrb[2].mxu1  ;;  %v1524_v11 = vpack.c.bf16 %v899_v63, %v899_v63 }
 0x128   : > { %v4368_v35 = vpop.f32.mrb[3].mxu1  ;;  %v1525_v15 = vpack.c.bf16 %v951_v1, %v951_v1 }
 0x12c   : > { %v1002_v36 = vpop.f32.mrb[4].mxu0 }
 0x12d   : > { %v4375_v37 = vpop.f32.mrb[5].mxu0  ;;  %v1054_v38 = vpop.f32.mrb[4].mxu1  ;;  %v1003_v22 = vadd.f32 %v4086_v16, %v1002_v36 }
 0x12e   : > { %v1005_v39 = vpop.f32.mrb[6].mxu0  ;;  %v4383_v40 = vpop.f32.mrb[5].mxu1  ;;  %v1055_v23 = vadd.f32 %v4087_v19, %v1054_v38 }
 0x12f   : > { %v4376_v41 = vpop.f32.mrb[7].mxu0  ;;  %v1057_v42 = vpop.f32.mrb[6].mxu1  ;;  %v1526_v24 = vpack.c.bf16 %v1003_v22, %v1003_v22 }
 0x130   : > { %v4384_v43 = vpop.f32.mrb[7].mxu1  ;;  %v1527_v25 = vpack.c.bf16 %v1055_v23, %v1055_v23 }
 0x134   : > { %v1130_v46 = vpop.f32.mrb[8].mxu0 }
 0x135   : > { %v1131_v47 = vadd.f32 %v4100_v44, %v1130_v46  ;;  %v1182_v48 = vpop.f32.mrb[8].mxu1  ;;  %v4391_v49 = vpop.f32.mrb[9].mxu0 }
 0x136   : > { %v1183_v50 = vadd.f32 %v4101_v45, %v1182_v48  ;;  %v1133_v51 = vpop.f32.mrb[10].mxu0  ;;  %v4399_v52 = vpop.f32.mrb[9].mxu1 }
 0x137   : > { %v1528_v53 = vpack.c.bf16 %v1131_v47, %v1131_v47  ;;  %v4392_v54 = vpop.f32.mrb[11].mxu0  ;;  %v1185_v55 = vpop.f32.mrb[10].mxu1 }
 0x138   : > { %v1529_v57 = vpack.c.bf16 %v1183_v50, %v1183_v50  ;;  %v4400_v58 = vpop.f32.mrb[11].mxu1  ;;  %v754_v50 = vld [vmem:[%s5790_s26] sm:$0xff] }
 0x139   : > { %v1537_v60 = vsel %vm1532_vm3, %v1528_v53, 0 }
 0x13a   : > { %v1583_v61 = vsel %vm1532_vm3, %v1529_v57, 0  ;;  %4450 = vmatpush3.bf16.xpose.msra.mxu0 %v1537_v60 }
 0x13b   : > { %4456 = vmatpush3.bf16.xpose.msra.mxu1 %v1583_v61  ;;  %4461 = vmatprep.subr.bf16.mxu0 %v4983_v2 }
 0x13c   : > { %v1234_v3 = vpop.f32.mrb[12].mxu0  ;;  %4467 = vmatprep.subr.bf16.mxu1 %v4983_v2 }
 0x13d   : > { %v1235_v4 = vadd.f32 %v4102_v62, %v1234_v3  ;;  %v1286_v5 = vpop.f32.mrb[12].mxu1  ;;  %v4407_v7 = vpop.f32.mrb[13].mxu0 }
 0x13e   : > { %v1287_v8 = vadd.f32 %v4103_v0, %v1286_v5  ;;  %v1237_v9 = vpop.f32.mrb[14].mxu0  ;;  %v4415_v10 = vpop.f32.mrb[13].mxu1 }
 0x13f   : > { %v1530_v12 = vpack.c.bf16 %v1235_v4, %v1235_v4  ;;  %v4408_v13 = vpop.f32.mrb[15].mxu0  ;;  %v1289_v14 = vpop.f32.mrb[14].mxu1 }
 0x140   : > { %v1531_v17 = vpack.c.bf16 %v1287_v8, %v1287_v8  ;;  %v4416_v18 = vpop.f32.mrb[15].mxu1 }
 0x141   : > { %v1629_v20 = vsel %vm1532_vm3, %v1530_v12, 0  ;;  %4452 = vmatmul.mubr.msk.bf16.vlgmr.msra.gmra.mrb[24].mxu0 %vm1532_vm3, %v1524_v11 }
 0x142   : > { %v1675_v21 = vsel %vm1532_vm3, %v1531_v17, 0  ;;  %4458 = vmatmul.mubr.msk.bf16.vlgmr.msra.gmra.mrb[24].mxu1 %vm1532_vm3, %v1525_v15  ;;  %4462 = vmatpush3.bf16.xpose.msra.mxu0 %v1629_v20 }
 0x143   : > { %4468 = vmatpush3.bf16.xpose.msra.mxu1 %v1675_v21  ;;  %4463 = vmatprep.mubr.msk.bf16.mxu0 %vm4984_vm1, %v4983_v2 }
 0x144   : > { %4469 = vmatprep.mubr.msk.bf16.mxu1 %vm4984_vm1, %v4983_v2  ;;  %4473 = vmatprep.subr.bf16.mxu0 %v4983_v2  ;;  %v1362_v27 = vpop.f32.mrb[16].mxu0 }
 0x145   : > { %4479 = vmatprep.subr.bf16.mxu1 %v4983_v2  ;;  %v1363_v29 = vadd.f32 %v4116_v26, %v1362_v27  ;;  %v4423_v30 = vpop.f32.mrb[17].mxu0 }
 0x146   : > { %v1365_v31 = vpop.f32.mrb[18].mxu0  ;;  %v1414_v32 = vpop.f32.mrb[16].mxu1 }
 0x147   : > { %v1765_v33 = vpack.c.bf16 %v1363_v29, %v1363_v29  ;;  %v4424_v34 = vpop.f32.mrb[19].mxu0  ;;  %v1415_v35 = vadd.f32 %v4117_v28, %v1414_v32  ;;  %v4431_v36 = vpop.f32.mrb[17].mxu1 }
 0x148   : > { %v1417_v37 = vpop.f32.mrb[18].mxu1 }
 0x149   : > { %4464 = vmatmul.mubr.msk.bf16.vlgmr.msra.gmra.mrb[28].mxu0 %vm1532_vm3, %v1526_v24  ;;  %v1774_v38 = vsel %vm1772_vm4, %v1765_v33, 0  ;;  %v1766_v39 = vpack.c.bf16 %v1415_v35, %v1415_v35  ;;  %v4432_v40 = vpop.f32.mrb[19].mxu1  ;;  %v4118_v35 = vld [vmem:[%s5179_s1 + $0xa] ss:$0 sm:$0xff] }
 0x14a   : > { %4470 = vmatmul.mubr.msk.bf16.vlgmr.msra.gmra.mrb[28].mxu1 %vm1532_vm3, %v1527_v25  ;;  %4475 = vmatprep.mubr.msk.bf16.mxu0 %vm4984_vm1, %v4983_v2 }
 0x14b   : > { %4481 = vmatprep.mubr.msk.bf16.mxu1 %vm4984_vm1, %v4983_v2  ;;  %4474 = vmatpush3.bf16.msra.mxu0 %v1774_v38  ;;  %v1820_v41 = vsel %vm1772_vm4, %v1766_v39, 0  ;;  %v4119_v38 = vld [vmem:[%s5179_s1 + $0xb] ss:$0 sm:$0xff] }
 0x14c   : > { %4485 = vmatprep.subr.bf16.mxu0 %v4983_v2  ;;  %4480 = vmatpush3.bf16.msra.mxu1 %v1820_v41  ;;  %v5365_v42 = vpop.f32.mrb[20].mxu0 }
 0x14d   : > { %4491 = vmatprep.subr.bf16.mxu1 %v4983_v2  ;;  %v4439_v44 = vpop.f32.mrb[21].mxu0  ;;  %v1467_v36 = vadd.f32 %v4118_v35, %v5365_v42 }
 0x14e   : > { %v5367_v43 = vpop.f32.mrb[20].mxu1  ;;  %v1469_v46 = vpop.f32.mrb[22].mxu0 }
 0x14f   : > { %v4447_v45 = vpop.f32.mrb[21].mxu1  ;;  %v4440_v48 = vpop.f32.mrb[23].mxu0  ;;  %v1767_v40 = vpack.c.bf16 %v1467_v36, %v1467_v36  ;;  %v1519_v41 = vadd.f32 %v4119_v38, %v5367_v43  ;;  %v818_v43 = vld [vmem:[%s5165_s14] sm:$0xf] }
 0x150   : > { %v1521_v47 = vpop.f32.mrb[22].mxu1 }
 0x151   : > { %v4448_v49 = vpop.f32.mrb[23].mxu1  ;;  %v1866_v48 = vsel %vm1772_vm4, %v1767_v40, 0 }
 0x152   : > { %v1768_v49 = vpack.c.bf16 %v1519_v41, %v1519_v41  ;;  %v4144_v41 = vld [vmem:[%s5792_s17] ss:$0 sm:$0xff] }
 0x214   : > { %v1573_v51 = vpop.f32.mrb[24].mxu0 }
 0x215   : > { %v1574_v52 = vadd.f32 %v1573_v51, %v754_v50  ;;  %v1619_v53 = vpop.f32.mrb[24].mxu1  ;;  %v4453_v54 = vpop.f32.mrb[25].mxu0 }
 0x216   : > { %v4459_v55 = vpop.f32.mrb[25].mxu1  ;;  %v1576_v56 = vpop.f32.mrb[26].mxu0  ;;  %v1620_v57 = vadd.f32 %v1619_v53, %v754_v50 }
 0x217   : > { %v1622_v58 = vpop.f32.mrb[26].mxu1  ;;  %v4454_v59 = vpop.f32.mrb[27].mxu0  ;;  %v1717_v60 = vsel %vm1532_vm3, %v1574_v52, -inf  ;;  %v1962_v55 = vsel %vm1772_vm4, %v818_v43, 0 }
 0x218   : > { %v4460_v61 = vpop.f32.mrb[27].mxu1  ;;  %1718 = vmax.xlane.f32.xlu0 %v1717_v60  ;;  %v1720_v62 = vsel %vm1532_vm3, %v1620_v57, -inf  ;;  %v819_v59 = vld [vmem:[%s5165_s14 + $0x4] sm:$0xf] }
 0x219   : > { %v2008_v60 = vsel %vm1772_vm4, %v819_v59, 0  ;;  %v820_v61 = vld [vmem:[%s5165_s14 + $0x8] sm:$0xf] }
 0x21c   : > { %1721 = vmax.xlane.f32.xlu0 %v1720_v62  ;;  %v1665_v63 = vpop.f32.mrb[28].mxu0 }
 0x21d   : > { %v1711_v0 = vpop.f32.mrb[28].mxu1  ;;  %v1666_v1 = vadd.f32 %v1665_v63, %v754_v50  ;;  %v4465_v3 = vpop.f32.mrb[29].mxu0 }
 0x21e   : > { %v4471_v4 = vpop.f32.mrb[29].mxu1  ;;  %v1668_v5 = vpop.f32.mrb[30].mxu0  ;;  %v1712_v7 = vadd.f32 %v1711_v0, %v754_v50 }
 0x21f   : > { %v1714_v8 = vpop.f32.mrb[30].mxu1  ;;  %v4466_v9 = vpop.f32.mrb[31].mxu0  ;;  %v1723_v10 = vsel %vm1532_vm3, %v1666_v1, -inf  ;;  %v821_v4 = vld [vmem:[%s5165_s14 + $0xc] sm:$0xf] }
 0x220   : > { %v4472_v11 = vpop.f32.mrb[31].mxu1  ;;  %1724 = vmax.xlane.f32.xlu1 %v1723_v10  ;;  %v1726_v12 = vsel %vm1532_vm3, %v1712_v7, -inf  ;;  %v2100_v10 = vsel %vm1772_vm4, %v821_v4, 0 }
 0x224   : > { %1727 = vmax.xlane.f32.xlu1 %v1726_v12 }
 0x2a5   : > { %v1719_v13 = vpop.xlane.xlu0 %1718 }
 0x2a6   : > { %v1729_v14 = vsub.f32 %v1574_v52, %v1719_v13  ;;  %v1912_v52 = vsel %vm1772_vm4, %v1768_v49, 0 }
 0x2a8   : > { %v1733_v15 = vmul.f32 1.442695, %v1729_v14 }
 0x2a9   : > { %v1722_v16 = vpop.xlane.xlu0 %1721 }
 0x2aa   : > { %4843 = vpow2.f32 %v1733_v15  ;;  %v1730_v17 = vsub.f32 %v1620_v57, %v1722_v16 }
 0x2ac   : > { %v1735_v18 = vmul.f32 1.442695, %v1730_v17 }
 0x2ad   : > { %v1725_v19 = vpop.xlane.xlu1 %1724 }
 0x2ae   : > { %4845 = vpow2.f32 %v1735_v18  ;;  %v1731_v20 = vsub.f32 %v1666_v1, %v1725_v19  ;;  %v2054_v1 = vsel %vm1772_vm4, %v820_v61, 0 }
 0x2b0   : > { %v1737_v21 = vmul.f32 1.442695, %v1731_v20 }
 0x2b1   : > { %v1728_v22 = vpop.xlane.xlu1 %1727 }
 0x2b2   : > { %4847 = vpow2.f32 %v1737_v21  ;;  %v1732_v23 = vsub.f32 %v1712_v7, %v1728_v22 }
 0x2b4   : > { %v4844_v24 = vpop.eup %4843  ;;  %v1739_v25 = vmul.f32 1.442695, %v1732_v23 }
 0x2b5   : > { %v1741_v26 = vsel %vm1532_vm3, %v4844_v24, 0.0 }
 0x2b6   : > { %4849 = vpow2.f32 %v1739_v25  ;;  %1742 = vadd.xlane.f32.xlu0 %v1741_v26 }
 0x2b8   : > { %v4846_v27 = vpop.eup %4845 }
 0x2b9   : > { %v1744_v28 = vsel %vm1532_vm3, %v4846_v27, 0.0 }
 0x2ba   : > { %1745 = vadd.xlane.f32.xlu1 %v1744_v28 }
 0x2bc   : > { %v4848_v29 = vpop.eup %4847 }
 0x2bd   : > { %v1747_v30 = vsel %vm1532_vm3, %v4848_v29, 0.0 }
 0x2be   : > { %1748 = vadd.xlane.f32.xlu0 %v1747_v30 }
 0x2c0   : > { %v4850_v31 = vpop.eup %4849 }
 0x2c1   : > { %v1750_v32 = vsel %vm1532_vm3, %v4850_v31, 0.0 }
 0x2c2   : > { %1751 = vadd.xlane.f32.xlu1 %v1750_v32 }
 0x343   : > { %v1743_v33 = vpop.xlane.xlu0 %1742 }
 0x344   : > { %4851 = vrcp.f32 %v1743_v33 }
 0x347   : > { %v1746_v34 = vpop.xlane.xlu1 %1745 }
 0x348   : > { %4853 = vrcp.f32 %v1746_v34 }
 0x34b   : > { %v1749_v37 = vpop.xlane.xlu0 %1748 }
 0x34c   : > { %4855 = vrcp.f32 %v1749_v37 }
 0x34e   : > { %v4852_v39 = vpop.eup %4851 }
 0x34f   : > { %v1757_v44 = vmul.f32 %v4852_v39, %v4844_v24  ;;  %v1752_v45 = vpop.xlane.xlu1 %1751 }
 0x350   : > { %4857 = vrcp.f32 %v1752_v45 }
 0x351   : > { %v1761_v46 = vpack.c.bf16 %v1757_v44, %v1757_v44 }
 0x352   : > { %v4854_v47 = vpop.eup %4853 }
 0x353   : > { %v1758_v50 = vmul.f32 %v4854_v47, %v4846_v27  ;;  %4476 = vmatmul.mubr.msk.bf16.vlgmr.msra.gmra.mrb[32].mxu0 %vm1532_vm3, %v1761_v46 }
 0x354   : > { %4486 = vmatpush3.bf16.msra.mxu0 %v1866_v48  ;;  %4487 = vmatprep.mubr.msk.bf16.mxu0 %vm4984_vm1, %v4983_v2 }
 0x355   : > { %v1762_v42 = vpack.c.bf16 %v1758_v50, %v1758_v50  ;;  %4497 = vmatprep.subr.bf16.mxu0 %v4983_v2 }
 0x356   : > { %v4856_v51 = vpop.eup %4855 }
 0x357   : > { %v1759_v53 = vmul.f32 %v4856_v51, %v4848_v29  ;;  %4482 = vmatmul.mubr.msk.bf16.vlgmr.msra.gmra.mrb[32].mxu1 %vm1532_vm3, %v1762_v42 }
 0x358   : > { %4492 = vmatpush3.bf16.msra.mxu1 %v1912_v52  ;;  %4493 = vmatprep.mubr.msk.bf16.mxu1 %vm4984_vm1, %v4983_v2 }
 0x359   : > { %v1763_v54 = vpack.c.bf16 %v1759_v53, %v1759_v53  ;;  %4503 = vmatprep.subr.bf16.mxu1 %v4983_v2 }
 0x35a   : > { %v4858_v56 = vpop.eup %4857 }
 0x35b   : > { %v1760_v57 = vmul.f32 %v4858_v56, %v4850_v31  ;;  %4488 = vmatmul.mubr.msk.bf16.vlgmr.msra.gmra.mrb[36].mxu0 %vm1532_vm3, %v1763_v54  ;;  %v4816_v56 = vld [vmem:[%s5184_s15 + $0x10] sm:$0xff]  }
 0x35c   : > { %4498 = vmatpush3.bf16.msra.mxu0 %v1962_v55  ;;  %4499 = vmatprep.mubr.msk.bf16.mxu0 %vm4984_vm1, %v4983_v2  ;;  %v4815_v55 = vld [vmem:[%s5184_s15] sm:$0xff]  }
 0x35d   : > { %v1764_v58 = vpack.c.bf16 %v1760_v57, %v1760_v57  ;;  %4509 = vmatprep.subr.bf16.mxu0 %v4983_v2  ;;  %v4817_v57 = vld [vmem:[%s5184_s15 + $0x8] sm:$0xff]  }
 0x35f   : > { %4494 = vmatmul.mubr.msk.bf16.vlgmr.msra.gmra.mrb[36].mxu1 %vm1532_vm3, %v1764_v58  ;;  %v4818_v58 = vld [vmem:[%s5184_s15 + $0x18] sm:$0xff]  }
 0x360   : > { %4505 = vmatprep.mubr.msk.bf16.mxu1 %vm4984_vm1, %v4983_v2  ;;  %4504 = vmatpush3.bf16.msra.mxu1 %v2008_v60  ;;  %v2171_v60 = vlaneseq }
 0x361   : > { %4515 = vmatprep.subr.bf16.mxu1 %v4983_v2 }
 0x426   : > { %v1810_v62 = vpop.f32.mrb[32].mxu0 }
 0x427   : > { %v1954_v63 = vpack.c.bf16 %v1810_v62, %v1810_v62  ;;  %v4477_v0 = vpop.f32.mrb[33].mxu0  ;;  %v2172_v62 = vshrl.u32 %v2171_v60, 7 }
 0x428   : > { %v1813_v3 = vpop.f32.mrb[34].mxu0  ;;  %v755_v0 = vld [vmem:[%s5216_s21] sm:$0x3] }
 0x429   : > { %v4478_v5 = vpop.f32.mrb[35].mxu0  ;;  %4500 = vmatmul.mubr.msk.bf16.vlgmr.msra.gmra.mrb[40].mxu0 %vm1532_vm3, %v1954_v63  ;;  %v5444_v63 = vsub.s32 0, %v2172_v62 }
 0x42a   : > { %v1856_v7 = vpop.f32.mrb[32].mxu1  ;;  %4510 = vmatpush3.bf16.msra.mxu0 %v2054_v1  ;;  %4511 = vmatprep.mubr.msk.bf16.mxu0 %vm4984_vm1, %v4983_v2  ;;  %v5447_v1 = vsub.s32 1, %v2172_v62  ;;  %v4145_v62 = vld [vmem:[%s5189_s2] ss:$0 sm:$0xff] }
 0x42b   : > { %v1955_v8 = vpack.c.bf16 %v1856_v7, %v1856_v7  ;;  %v4483_v9 = vpop.f32.mrb[33].mxu1  ;;  %4521 = vmatprep.subr.bf16.mxu0 %v4983_v2  ;;  %v2174_v3 = vrot.slane %v755_v0, %v5444_v63 }
 0x42c   : > { %v1859_v11 = vpop.f32.mrb[34].mxu1  ;;  %v2179_v7 = vrot.slane %v755_v0, %v5447_v1  ;;  %v4146_v0 = vld [vmem:[%s5189_s2 + $0x1] ss:$0 sm:$0xff] }
 0x42d   : > { %v4484_v12 = vpop.f32.mrb[35].mxu1  ;;  %4506 = vmatmul.mubr.msk.bf16.vlgmr.msra.gmra.mrb[40].mxu1 %vm1532_vm3, %v1955_v8  ;;  %v4820_v11 = vld [vmem:[%s5184_s15 + $0x30] sm:$0xff]  }
 0x42e   : > { %v1902_v13 = vpop.f32.mrb[36].mxu0  ;;  %4516 = vmatpush3.bf16.msra.mxu1 %v2100_v10  ;;  %4517 = vmatprep.mubr.msk.bf16.mxu1 %vm4984_vm1, %v4983_v2  ;;  %v4819_v10 = vld [vmem:[%s5184_s15 + $0x20] sm:$0xff]  }
 0x42f   : > { %v1956_v14 = vpack.c.bf16 %v1902_v13, %v1902_v13  ;;  %v4489_v15 = vpop.f32.mrb[37].mxu0  ;;  %4529 = vmatprep.subr.bf16.mxu1 %v4983_v2  ;;  %v4821_v13 = vld [vmem:[%s5184_s15 + $0x28] sm:$0xff]  }
 0x430   : > { %v1905_v16 = vpop.f32.mrb[38].mxu0  ;;  %v4823_v15 = vld [vmem:[%s5184_s15 + $0x40] sm:$0xff]  }
 0x431   : > { %v4490_v17 = vpop.f32.mrb[39].mxu0  ;;  %4512 = vmatmul.mubr.msk.bf16.vlgmr.msra.gmra.mrb[44].mxu0 %vm1532_vm3, %v1956_v14  ;;  %v4822_v14 = vld [vmem:[%s5184_s15 + $0x38] sm:$0xff]   ;;  %v4824_v16 = vld [vmem:[%s5184_s15 + $0x50] sm:$0xff]  }
 0x432   : > { %v1948_v18 = vpop.f32.mrb[36].mxu1  ;;  %4525 = vmatprep.mubr.msk.bf16.mxu0 %vm4984_vm1, %v4983_v2  ;;  %4522 = vmatpush3.bf16.msra.mxu0 %v4815_v55  ;;  %v4825_v17 = vld [vmem:[%s5184_s15 + $0x48] sm:$0xff]  }
 0x433   : > { %v1957_v19 = vpack.c.bf16 %v1948_v18, %v1948_v18  ;;  %v4495_v20 = vpop.f32.mrb[37].mxu1  ;;  %4523 = vmatprep.subr.bf16.mxu0 %v4983_v2  ;;  %v4826_v18 = vld [vmem:[%s5184_s15 + $0x58] sm:$0xff]  }
 0x434   : > { %v1951_v21 = vpop.f32.mrb[38].mxu1 }
 0x435   : > { %v4496_v22 = vpop.f32.mrb[39].mxu1  ;;  %4518 = vmatmul.mubr.msk.bf16.vlgmr.msra.gmra.mrb[44].mxu1 %vm1532_vm3, %v1957_v19  ;;  %v2181_v19 = vld [vmem:[%s5793_s20] sm:$0xff] }
 0x436   : > { %4533 = vmatprep.mubr.msk.bf16.mxu1 %vm4984_vm1, %v4983_v2  ;;  %4530 = vmatpush3.bf16.msra.mxu1 %v4816_v56  ;;  %v2248_v20 = vpack.c.bf16 %v2181_v19, %v2181_v19  ;;  %v4827_v21 = vld [vmem:[%s5184_s15 + $0x60] sm:$0xff]   ;;  %v4828_v22 = vld [vmem:[%s5184_s15 + $0x70] sm:$0xff]  }
 0x437   : > { %4531 = vmatprep.subr.bf16.mxu1 %v4983_v2  ;;  %4524 = vmatpush3.bf16.msra.mxu0 %v4817_v57 }
 0x438   : > { %4537 = vmatprep.subr.bf16.mxu0 %v4983_v2 }
 0x43a   : > { %4532 = vmatpush3.bf16.msra.mxu1 %v4818_v58 }
 0x43b   : > { %4545 = vmatprep.subr.bf16.mxu1 %v4983_v2 }
 0x4fc   : > { %v1998_v23 = vpop.f32.mrb[40].mxu0 }
 0x4fd   : > { %v4501_v24 = vpop.f32.mrb[41].mxu0  ;;  %v2142_v28 = vsel %vm860_vm2, %v1998_v23, 0.0  ;;  %v4829_v23 = vld [vmem:[%s5184_s15 + $0x68] sm:$0xff]  }
 0x4fe   : > { %v2001_v25 = vpop.f32.mrb[42].mxu0  ;;  %v4830_v24 = vld [vmem:[%s5184_s15 + $0x78] sm:$0xff]  }
 0x4ff   : > { %v4502_v26 = vpop.f32.mrb[43].mxu0  ;;  %v4831_v25 = vld [vmem:[%s5184_s15 + $0x80] sm:$0xff]  }
 0x500   : > { %v2044_v27 = vpop.f32.mrb[40].mxu1  ;;  %v4832_v26 = vld [vmem:[%s5184_s15 + $0x90] sm:$0xff]  }
 0x501   : > { %v2143_v29 = vsel %vm860_vm2, %v2044_v27, 0.0  ;;  %v4507_v30 = vpop.f32.mrb[41].mxu1  ;;  %v4833_v27 = vld [vmem:[%s5184_s15 + $0x88] sm:$0xff]  }
 0x502   : > { %v2144_v31 = vadd.f32 %v2143_v29, %v2142_v28  ;;  %v2047_v32 = vpop.f32.mrb[42].mxu1  ;;  %v4834_v28 = vld [vmem:[%s5184_s15 + $0x98] sm:$0xff]   ;;  %v4835_v29 = vld [vmem:[%s5184_s15 + $0xa0] sm:$0xff]   ;;  %v4836_v30 = vld [vmem:[%s5184_s15 + $0xb0] sm:$0xff]  }
 0x503   : > { %v4508_v33 = vpop.f32.mrb[43].mxu1  ;;  %v4838_v32 = vld [vmem:[%s5184_s15 + $0xb8] sm:$0xff]  }
 0x504   : > { %v2090_v34 = vpop.f32.mrb[44].mxu0 }
 0x505   : > { %v2145_v35 = vsel %vm860_vm2, %v2090_v34, 0.0  ;;  %v4513_v36 = vpop.f32.mrb[45].mxu0 }
 0x506   : > { %v2146_v37 = vadd.f32 %v2145_v35, %v2144_v31  ;;  %v2093_v38 = vpop.f32.mrb[46].mxu0  ;;  %v4837_v31 = vld [vmem:[%s5184_s15 + $0xa8] sm:$0xff]  }
 0x507   : > { %v4514_v39 = vpop.f32.mrb[47].mxu0 }
 0x508   : > { %v2136_v40 = vpop.f32.mrb[44].mxu1 }
 0x509   : > { %v2147_v44 = vsel %vm860_vm2, %v2136_v40, 0.0  ;;  %v4519_v45 = vpop.f32.mrb[45].mxu1 }
 0x50a   : > { %v2148_v46 = vadd.f32 %v2147_v44, %v2146_v37  ;;  %v2139_v47 = vpop.f32.mrb[46].mxu1 }
 0x50b   : > { %v4520_v48 = vpop.f32.mrb[47].mxu1 }
 0x50c   : > { %v2155_v49 = vadd.f32 %v4144_v41, %v2148_v46 }
 0x50e   : > { %v2156_v50 = vadd.f32 %v2155_v49, %v5235_v6 }
 0x510   : > { %v2157_v42 = vsel %vm860_vm2, %v2156_v50, 0.0 }
 0x511   : > { %2158 = vadd.xlane.f32.xlu0 %v2157_v42  ;;  %v4161_v42 = vld [vmem:[%s5189_s2 + $0x4] ss:$0 sm:$0xff] }
 0x59e   : > { %v2159_v51 = vpop.xlane.xlu0 %2158 }
 0x59f   : > { %v2161_v43 = vmul.f32 0.03125, %v2159_v51  ;;  %v4162_v51 = vld [vmem:[%s5189_s2 + $0x5] ss:$0 sm:$0xff] }
 0x5a1   : > { %v2162_v52 = vsub.f32 %v2156_v50, %v2161_v43 }
 0x5a3   : > { %v2163_v53 = vmul.f32 %v2162_v52, %v2162_v52 }
 0x5a5   : > { %v2164_v54 = vsel %vm860_vm2, %v2163_v53, 0.0 }
 0x5a6   : > { %2165 = vadd.xlane.f32.xlu1 %v2164_v54 }
 0x633   : > { %v2166_v6 = vpop.xlane.xlu1 %2165 }
 0x634   : > { %v2167_v59 = vmul.f32 0.03125, %v2166_v6 }
 0x636   : > { %v2168_v61 = vadd.f32 1e-05, %v2167_v59 }
 0x638   : > { %4859 = vrsqrt.f32 %v2168_v61 }
 0x642   : > { %v4860_v4 = vpop.eup %4859 }
 0x643   : > { %v2170_v5 = vmul.f32 %v4860_v4, %v2162_v52 }
 0x645   : > { %v2175_v8 = vmul.f32 %v2174_v3, %v2170_v5  ;;  %v4163_v5 = vld [vmem:[%s5189_s2 + $0x6] ss:$0 sm:$0xff] }
 0x647   : > { %v5451_v9 = vadd.f32 %v2179_v7, %v2175_v8  ;;  %v4164_v7 = vld [vmem:[%s5189_s2 + $0x7] ss:$0 sm:$0xff] }
 0x649   : > { %v2247_v12 = vpack.c.bf16 %v5451_v9, %v5451_v9 }
 0x64b   : > { %4526 = vmatmul.mubr.msk.bf16.vlgmr.msra.gmra.mrb[48].mxu0 %vm860_vm2, %v2247_v12  ;;  %4534 = vmatmul.mubr.msk.bf16.vlgmr.msra.gmra.mrb[48].mxu1 %vm860_vm2, %v2247_v12 }
 0x64c   : > { %4538 = vmatpush3.bf16.msra.mxu0 %v4819_v10  ;;  %4546 = vmatpush3.bf16.msra.mxu1 %v4820_v11 }
 0x64d   : > { %4539 = vmatprep.subr.bf16.mxu0 %v4983_v2  ;;  %4547 = vmatprep.subr.bf16.mxu1 %v4983_v2 }
 0x64e   : > { %4541 = vmatprep.mubr.msk.bf16.mxu0 %vm4984_vm1, %v4983_v2  ;;  %4549 = vmatprep.mubr.msk.bf16.mxu1 %vm4984_vm1, %v4983_v2 }
 0x650   : > { %4540 = vmatpush3.bf16.msra.mxu0 %v4821_v13  ;;  %4548 = vmatpush3.bf16.msra.mxu1 %v4822_v14 }
 0x651   : > { %4553 = vmatprep.subr.bf16.mxu0 %v4983_v2  ;;  %4561 = vmatprep.subr.bf16.mxu1 %v4983_v2 }
 0x653   : > { %4542 = vmatmul.mubr.msk.bf16.vlgmr.msra.gmra.mrb[52].mxu0 %vm860_vm2, %v2247_v12  ;;  %4550 = vmatmul.mubr.msk.bf16.vlgmr.msra.gmra.mrb[52].mxu1 %vm860_vm2, %v2247_v12 }
 0x654   : > { %4554 = vmatpush3.bf16.msra.mxu0 %v4823_v15  ;;  %4562 = vmatpush3.bf16.msra.mxu1 %v4824_v16 }
 0x655   : > { %4555 = vmatprep.subr.bf16.mxu0 %v4983_v2  ;;  %4563 = vmatprep.subr.bf16.mxu1 %v4983_v2 }
 0x656   : > { %4557 = vmatprep.mubr.msk.bf16.mxu0 %vm4984_vm1, %v4983_v2  ;;  %4565 = vmatprep.mubr.msk.bf16.mxu1 %vm4984_vm1, %v4983_v2 }
 0x658   : > { %4556 = vmatpush3.bf16.msra.mxu0 %v4825_v17  ;;  %4564 = vmatpush3.bf16.msra.mxu1 %v4826_v18 }
 0x659   : > { %4569 = vmatprep.subr.bf16.mxu0 %v4983_v2  ;;  %4577 = vmatprep.subr.bf16.mxu1 %v4983_v2 }
 0x65b   : > { %4558 = vmatmul.mubr.msk.bf16.vlgmr.msra.gmra.mrb[56].mxu0 %vm860_vm2, %v2248_v20  ;;  %4566 = vmatmul.mubr.msk.bf16.vlgmr.msra.gmra.mrb[56].mxu1 %vm860_vm2, %v2248_v20 }
 0x65c   : > { %4570 = vmatpush3.bf16.msra.mxu0 %v4827_v21  ;;  %4578 = vmatpush3.bf16.msra.mxu1 %v4828_v22 }
 0x65d   : > { %4571 = vmatprep.subr.bf16.mxu0 %v4983_v2  ;;  %4579 = vmatprep.subr.bf16.mxu1 %v4983_v2 }
 0x65e   : > { %4573 = vmatprep.mubr.msk.bf16.mxu0 %vm4984_vm1, %v4983_v2  ;;  %4581 = vmatprep.mubr.msk.bf16.mxu1 %vm4984_vm1, %v4983_v2 }
 0x660   : > { %4572 = vmatpush3.bf16.msra.mxu0 %v4829_v23  ;;  %4580 = vmatpush3.bf16.msra.mxu1 %v4830_v24 }
 0x661   : > { %4585 = vmatprep.subr.bf16.mxu0 %v4983_v2  ;;  %4593 = vmatprep.subr.bf16.mxu1 %v4983_v2 }
 0x663   : > { %4574 = vmatmul.mubr.msk.bf16.vlgmr.msra.gmra.mrb[60].mxu0 %vm860_vm2, %v2248_v20  ;;  %4582 = vmatmul.mubr.msk.bf16.vlgmr.msra.gmra.mrb[60].mxu1 %vm860_vm2, %v2248_v20 }
 0x664   : > { %4586 = vmatpush3.bf16.msra.mxu0 %v4831_v25  ;;  %4589 = vmatprep.mubr.msk.bf16.mxu0 %vm4984_vm1, %v4983_v2  ;;  %v4147_v25 = vld [vmem:[%s5189_s2 + $0x2] ss:$0 sm:$0xff] }
 0x665   : > { %4587 = vmatprep.subr.bf16.mxu0 %v4983_v2  ;;  %4597 = vmatprep.mubr.msk.bf16.mxu1 %vm4984_vm1, %v4983_v2 }
 0x666   : > { %4594 = vmatpush3.bf16.msra.mxu1 %v4832_v26  ;;  %v4148_v26 = vld [vmem:[%s5189_s2 + $0x3] ss:$0 sm:$0xff] }
 0x667   : > { %4595 = vmatprep.subr.bf16.mxu1 %v4983_v2 }
 0x668   : > { %4588 = vmatpush3.bf16.msra.mxu0 %v4833_v27 }
 0x669   : > { %4601 = vmatprep.subr.bf16.mxu0 %v4983_v2 }
 0x66a   : > { %4596 = vmatpush3.bf16.msra.mxu1 %v4834_v28 }
 0x66b   : > { %4590 = vmatmul.mubr.msk.bf16.vlgmr.msra.gmra.mrb[64].mxu0 %vm860_vm2, %v2248_v20  ;;  %4609 = vmatprep.subr.bf16.mxu1 %v4983_v2 }
 0x66c   : > { %4605 = vmatprep.mubr.msk.bf16.mxu0 %vm4984_vm1, %v4983_v2  ;;  %4602 = vmatpush3.bf16.msra.mxu0 %v4835_v29 }
 0x66d   : > { %4598 = vmatmul.mubr.msk.bf16.vlgmr.msra.gmra.mrb[64].mxu1 %vm860_vm2, %v2248_v20  ;;  %4603 = vmatprep.subr.bf16.mxu0 %v4983_v2 }
 0x66e   : > { %4610 = vmatpush3.bf16.msra.mxu1 %v4836_v30  ;;  %4613 = vmatprep.mubr.msk.bf16.mxu1 %vm4984_vm1, %v4983_v2 }
 0x66f   : > { %4611 = vmatprep.subr.bf16.mxu1 %v4983_v2 }
 0x670   : > { %4604 = vmatpush3.bf16.msra.mxu0 %v4837_v31 }
 0x671   : > { %4617 = vmatprep.subr.bf16.mxu0 %v4983_v2 }
 0x672   : > { %4612 = vmatpush3.bf16.msra.mxu1 %v4838_v32 }
 0x673   : > { %4623 = vmatprep.subr.bf16.mxu1 %v4983_v2  ;;  %4606 = vmatmul.mubr.msk.bf16.vlgmr.msra.gmra.mrb[68].mxu0 %vm860_vm2, %v2248_v20 }
 0x674   : > { %4619 = vmatprep.mubr.msk.bf16.mxu0 %vm4984_vm1, %v4983_v2 }
 0x675   : > { %4614 = vmatmul.mubr.msk.bf16.vlgmr.msra.gmra.mrb[68].mxu1 %vm860_vm2, %v2248_v20 }
 0x676   : > { %4625 = vmatprep.mubr.msk.bf16.mxu1 %vm4984_vm1, %v4983_v2 }
 0x71e   : > { %v2322_v33 = vpop.f32.mrb[48].mxu0  ;;  %v2374_v34 = vpop.f32.mrb[48].mxu1 }
 0x71f   : > { %v4527_v35 = vpop.f32.mrb[49].mxu0  ;;  %v4535_v36 = vpop.f32.mrb[49].mxu1  ;;  %v2323_v8 = vadd.f32 %v4145_v62, %v2322_v33  ;;  %v2375_v10 = vadd.f32 %v4146_v0, %v2374_v34  ;;  %v4177_v33 = vld [vmem:[%s5189_s2 + $0x8] ss:$0 sm:$0xff] }
 0x720   : > { %v2325_v37 = vpop.f32.mrb[50].mxu0  ;;  %v2377_v38 = vpop.f32.mrb[50].mxu1  ;;  %v4178_v35 = vld [vmem:[%s5189_s2 + $0x9] ss:$0 sm:$0xff] }
 0x721   : > { %v4528_v39 = vpop.f32.mrb[51].mxu0  ;;  %v4536_v40 = vpop.f32.mrb[51].mxu1  ;;  %v2951_v19 = vpack.c.bf16 %v2323_v8, %v2323_v8  ;;  %v2952_v20 = vpack.c.bf16 %v2375_v10, %v2375_v10 }
 0x726   : > { %v2426_v41 = vpop.f32.mrb[52].mxu0  ;;  %v2478_v44 = vpop.f32.mrb[52].mxu1 }
 0x727   : > { %v4543_v45 = vpop.f32.mrb[53].mxu0  ;;  %v4551_v46 = vpop.f32.mrb[53].mxu1  ;;  %v2427_v29 = vadd.f32 %v4147_v25, %v2426_v41  ;;  %v2479_v30 = vadd.f32 %v4148_v26, %v2478_v44 }
 0x728   : > { %v2429_v47 = vpop.f32.mrb[54].mxu0  ;;  %v2481_v48 = vpop.f32.mrb[54].mxu1 }
 0x729   : > { %v4544_v49 = vpop.f32.mrb[55].mxu0  ;;  %v4552_v50 = vpop.f32.mrb[55].mxu1  ;;  %v2953_v31 = vpack.c.bf16 %v2427_v29, %v2427_v29  ;;  %v2954_v32 = vpack.c.bf16 %v2479_v30, %v2479_v30 }
 0x72e   : > { %v2557_v43 = vpop.f32.mrb[56].mxu0  ;;  %v2609_v52 = vpop.f32.mrb[56].mxu1 }
 0x72f   : > { %v2558_v53 = vadd.f32 %v4161_v42, %v2557_v43  ;;  %v2610_v54 = vadd.f32 %v4162_v51, %v2609_v52  ;;  %v4559_v55 = vpop.f32.mrb[57].mxu0  ;;  %v4567_v56 = vpop.f32.mrb[57].mxu1 }
 0x730   : > { %v2560_v57 = vpop.f32.mrb[58].mxu0  ;;  %v2612_v58 = vpop.f32.mrb[58].mxu1 }
 0x731   : > { %v2955_v6 = vpack.c.bf16 %v2558_v53, %v2558_v53  ;;  %v2956_v59 = vpack.c.bf16 %v2610_v54, %v2610_v54  ;;  %v4560_v60 = vpop.f32.mrb[59].mxu0  ;;  %v4568_v61 = vpop.f32.mrb[59].mxu1 }
 0x733   : > { %v2963_v3 = vsel %vm1532_vm3, %v2955_v6, 0  ;;  %v3009_v4 = vsel %vm1532_vm3, %v2956_v59, 0 }
 0x734   : > { %4618 = vmatpush3.bf16.xpose.msra.mxu0 %v2963_v3  ;;  %4624 = vmatpush3.bf16.xpose.msra.mxu1 %v3009_v4 }
 0x735   : > { %4629 = vmatprep.subr.bf16.mxu0 %v4983_v2  ;;  %4635 = vmatprep.subr.bf16.mxu1 %v4983_v2 }
 0x736   : > { %v2661_v11 = vpop.f32.mrb[60].mxu0  ;;  %v2713_v12 = vpop.f32.mrb[60].mxu1 }
 0x737   : > { %v2662_v13 = vadd.f32 %v4163_v5, %v2661_v11  ;;  %v2714_v14 = vadd.f32 %v4164_v7, %v2713_v12  ;;  %v4575_v15 = vpop.f32.mrb[61].mxu0  ;;  %v4583_v16 = vpop.f32.mrb[61].mxu1 }
 0x738   : > { %v2664_v17 = vpop.f32.mrb[62].mxu0  ;;  %v2716_v18 = vpop.f32.mrb[62].mxu1 }
 0x739   : > { %v2957_v21 = vpack.c.bf16 %v2662_v13, %v2662_v13  ;;  %v2958_v22 = vpack.c.bf16 %v2714_v14, %v2714_v14  ;;  %v4576_v23 = vpop.f32.mrb[63].mxu0  ;;  %v4584_v24 = vpop.f32.mrb[63].mxu1 }
 0x73b   : > { %v3055_v27 = vsel %vm1532_vm3, %v2957_v21, 0  ;;  %v3101_v28 = vsel %vm1532_vm3, %v2958_v22, 0  ;;  %4620 = vmatmul.mubr.msk.bf16.vlgmr.msra.gmra.mrb[72].mxu0 %vm1532_vm3, %v2951_v19  ;;  %4626 = vmatmul.mubr.msk.bf16.vlgmr.msra.gmra.mrb[72].mxu1 %vm1532_vm3, %v2952_v20 }
 0x73c   : > { %4630 = vmatpush3.bf16.xpose.msra.mxu0 %v3055_v27  ;;  %4636 = vmatpush3.bf16.xpose.msra.mxu1 %v3101_v28 }
 0x73d   : > { %4631 = vmatprep.mubr.msk.bf16.mxu0 %vm4984_vm1, %v4983_v2  ;;  %4637 = vmatprep.mubr.msk.bf16.mxu1 %vm4984_vm1, %v4983_v2 }
 0x73e   : > { %4641 = vmatprep.subr.bf16.mxu0 %v4983_v2  ;;  %4647 = vmatprep.subr.bf16.mxu1 %v4983_v2  ;;  %v2789_v34 = vpop.f32.mrb[64].mxu0 }
 0x73f   : > { %v2790_v36 = vadd.f32 %v4177_v33, %v2789_v34  ;;  %v4591_v37 = vpop.f32.mrb[65].mxu0 }
 0x740   : > { %v2792_v38 = vpop.f32.mrb[66].mxu0  ;;  %v2841_v39 = vpop.f32.mrb[64].mxu1 }
 0x741   : > { %v3191_v40 = vpack.c.bf16 %v2790_v36, %v2790_v36  ;;  %v2842_v41 = vadd.f32 %v4178_v35, %v2841_v39  ;;  %v4592_v44 = vpop.f32.mrb[67].mxu0  ;;  %v4599_v45 = vpop.f32.mrb[65].mxu1  ;;  %v4180_v39 = vld [vmem:[%s5189_s2 + $0xb] ss:$0 sm:$0xff] }
 0x742   : > { %v2844_v46 = vpop.f32.mrb[66].mxu1 }
 0x743   : > { %4632 = vmatmul.mubr.msk.bf16.vlgmr.msra.gmra.mrb[76].mxu0 %vm1532_vm3, %v2953_v31  ;;  %4638 = vmatmul.mubr.msk.bf16.vlgmr.msra.gmra.mrb[76].mxu1 %vm1532_vm3, %v2954_v32  ;;  %v3199_v47 = vsel %vm1772_vm4, %v3191_v40, 0  ;;  %v3192_v48 = vpack.c.bf16 %v2842_v41, %v2842_v41  ;;  %v4600_v49 = vpop.f32.mrb[67].mxu1  ;;  %v4179_v40 = vld [vmem:[%s5189_s2 + $0xa] ss:$0 sm:$0xff] }
 0x744   : > { %4643 = vmatprep.mubr.msk.bf16.mxu0 %vm4984_vm1, %v4983_v2  ;;  %4649 = vmatprep.mubr.msk.bf16.mxu1 %vm4984_vm1, %v4983_v2 }
 0x745   : > { %4642 = vmatpush3.bf16.msra.mxu0 %v3199_v47  ;;  %v3245_v50 = vsel %vm1772_vm4, %v3192_v48, 0 }
 0x746   : > { %4653 = vmatprep.subr.bf16.mxu0 %v4983_v2  ;;  %4648 = vmatpush3.bf16.msra.mxu1 %v3245_v50  ;;  %v5566_v42 = vpop.f32.mrb[68].mxu0 }
 0x747   : > { %4659 = vmatprep.subr.bf16.mxu1 %v4983_v2  ;;  %v4607_v43 = vpop.f32.mrb[69].mxu0  ;;  %v2894_v45 = vadd.f32 %v4179_v40, %v5566_v42 }
 0x748   : > { %v5568_v51 = vpop.f32.mrb[68].mxu1  ;;  %v2896_v53 = vpop.f32.mrb[70].mxu0 }
 0x749   : > { %v4615_v52 = vpop.f32.mrb[69].mxu1  ;;  %v4608_v55 = vpop.f32.mrb[71].mxu0  ;;  %v2946_v41 = vadd.f32 %v4180_v39, %v5568_v51  ;;  %v3193_v43 = vpack.c.bf16 %v2894_v45, %v2894_v45 }
 0x74a   : > { %v2948_v54 = vpop.f32.mrb[70].mxu1 }
 0x74b   : > { %v4616_v56 = vpop.f32.mrb[71].mxu1  ;;  %v3194_v49 = vpack.c.bf16 %v2946_v41, %v2946_v41  ;;  %v3291_v51 = vsel %vm1772_vm4, %v3193_v43, 0  ;;  %v4205_v43 = vld [vmem:[%s730_s28] ss:$0 sm:$0xff] }
 0x74c   : > { %v2243_v56 = vld [vmem:[%s5194_s27 + $0x4] sm:$0xf] }
 0x74d   : > { %v3337_v55 = vsel %vm1772_vm4, %v3194_v49, 0 }
 0x80e   : > { %v2999_v57 = vpop.f32.mrb[72].mxu0  ;;  %v3045_v58 = vpop.f32.mrb[72].mxu1 }
 0x80f   : > { %v4621_v6 = vpop.f32.mrb[73].mxu0  ;;  %v4627_v59 = vpop.f32.mrb[73].mxu1  ;;  %v3146_v60 = vsel %vm1532_vm3, %v3045_v58, -inf  ;;  %v3143_v61 = vsel %vm1532_vm3, %v2999_v57, -inf }
 0x810   : > { %3147 = vmax.xlane.f32.xlu1 %v3146_v60  ;;  %v3048_v62 = vpop.f32.mrb[74].mxu1  ;;  %3144 = vmax.xlane.f32.xlu0 %v3143_v61  ;;  %v3002_v0 = vpop.f32.mrb[74].mxu0  ;;  %v2242_v6 = vld [vmem:[%s5194_s27] sm:$0xf]  ;;  %v3433_v61 = vsel %vm1772_vm4, %v2243_v56, 0 }
 0x811   : > { %v4622_v3 = vpop.f32.mrb[75].mxu0  ;;  %v4628_v4 = vpop.f32.mrb[75].mxu1  ;;  %v3387_v0 = vsel %vm1772_vm4, %v2242_v6, 0 }
 0x812   : > { %v2245_v3 = vld [vmem:[%s5194_s27 + $0xc] sm:$0xf]  ;;  %v2244_v4 = vld [vmem:[%s5194_s27 + $0x8] sm:$0xf] }
 0x816   : > { %v3091_v5 = vpop.f32.mrb[76].mxu0  ;;  %v3137_v7 = vpop.f32.mrb[76].mxu1 }
 0x817   : > { %v4633_v8 = vpop.f32.mrb[77].mxu0  ;;  %v4639_v10 = vpop.f32.mrb[77].mxu1  ;;  %v3152_v11 = vsel %vm1532_vm3, %v3137_v7, -inf  ;;  %v3149_v12 = vsel %vm1532_vm3, %v3091_v5, -inf }
 0x818   : > { %3153 = vmax.xlane.f32.xlu1 %v3152_v11  ;;  %v3140_v13 = vpop.f32.mrb[78].mxu1  ;;  %3150 = vmax.xlane.f32.xlu0 %v3149_v12  ;;  %v3094_v14 = vpop.f32.mrb[78].mxu0  ;;  %v3525_v11 = vsel %vm1772_vm4, %v2245_v3, 0  ;;  %v756_v3 = vld [vmem:[%s5216_s21 + $0x2] sm:$0x3] }
 0x819   : > { %v4634_v15 = vpop.f32.mrb[79].mxu0  ;;  %v4640_v16 = vpop.f32.mrb[79].mxu1 }
 0x81a   : > { %v3479_v15 = vsel %vm1772_vm4, %v2244_v4, 0  ;;  %v3598_v4 = vrot.slane %v756_v3, %v5444_v63 }
 0x89d   : > { %v3148_v17 = vpop.xlane.xlu1 %3147  ;;  %v3145_v18 = vpop.xlane.xlu0 %3144 }
 0x89e   : > { %v3156_v19 = vsub.f32 %v3045_v58, %v3148_v17  ;;  %v3155_v20 = vsub.f32 %v2999_v57, %v3145_v18 }
 0x8a0   : > { %v3161_v21 = vmul.f32 1.442695, %v3156_v19  ;;  %v3159_v22 = vmul.f32 1.442695, %v3155_v20 }
 0x8a2   : > { %4861 = vpow2.f32 %v3161_v21 }
 0x8a3   : > { %4863 = vpow2.f32 %v3159_v22 }
 0x8a5   : > { %v3154_v23 = vpop.xlane.xlu1 %3153  ;;  %v3151_v24 = vpop.xlane.xlu0 %3150 }
 0x8a6   : > { %v3158_v25 = vsub.f32 %v3137_v7, %v3154_v23  ;;  %v3157_v26 = vsub.f32 %v3091_v5, %v3151_v24 }
 0x8a8   : > { %v3165_v27 = vmul.f32 1.442695, %v3158_v25  ;;  %v3163_v28 = vmul.f32 1.442695, %v3157_v26 }
 0x8aa   : > { %4865 = vpow2.f32 %v3165_v27 }
 0x8ab   : > { %4867 = vpow2.f32 %v3163_v28 }
 0x8ac   : > { %v4862_v29 = vpop.eup %4861 }
 0x8ad   : > { %v4864_v30 = vpop.eup %4863  ;;  %v3170_v31 = vsel %vm1532_vm3, %v4862_v29, 0.0 }
 0x8ae   : > { %3171 = vadd.xlane.f32.xlu1 %v3170_v31  ;;  %v3167_v32 = vsel %vm1532_vm3, %v4864_v30, 0.0 }
 0x8af   : > { %3168 = vadd.xlane.f32.xlu0 %v3167_v32 }
 0x8b4   : > { %v4866_v33 = vpop.eup %4865 }
 0x8b5   : > { %v4868_v34 = vpop.eup %4867  ;;  %v3176_v35 = vsel %vm1532_vm3, %v4866_v33, 0.0 }
 0x8b6   : > { %3177 = vadd.xlane.f32.xlu1 %v3176_v35  ;;  %v3173_v36 = vsel %vm1532_vm3, %v4868_v34, 0.0 }
 0x8b7   : > { %3174 = vadd.xlane.f32.xlu0 %v3173_v36 }
 0x93b   : > { %v3172_v37 = vpop.xlane.xlu1 %3171 }
 0x93c   : > { %4869 = vrcp.f32 %v3172_v37  ;;  %v3169_v38 = vpop.xlane.xlu0 %3168 }
 0x93d   : > { %4871 = vrcp.f32 %v3169_v38 }
 0x943   : > { %v3178_v44 = vpop.xlane.xlu1 %3177 }
 0x944   : > { %4873 = vrcp.f32 %v3178_v44  ;;  %v3175_v46 = vpop.xlane.xlu0 %3174 }
 0x945   : > { %4875 = vrcp.f32 %v3175_v46 }
 0x946   : > { %v4870_v47 = vpop.eup %4869 }
 0x947   : > { %v4872_v48 = vpop.eup %4871  ;;  %v3184_v50 = vmul.f32 %v4870_v47, %v4862_v29 }
 0x948   : > { %v3183_v52 = vmul.f32 %v4872_v48, %v4864_v30 }
 0x949   : > { %v3188_v53 = vpack.c.bf16 %v3184_v50, %v3184_v50 }
 0x94a   : > { %v3187_v54 = vpack.c.bf16 %v3183_v52, %v3183_v52 }
 0x94b   : > { %4650 = vmatmul.mubr.msk.bf16.vlgmr.msra.gmra.mrb[80].mxu1 %vm1532_vm3, %v3188_v53 }
 0x94c   : > { %4644 = vmatmul.mubr.msk.bf16.vlgmr.msra.gmra.mrb[80].mxu0 %vm1532_vm3, %v3187_v54  ;;  %4660 = vmatpush3.bf16.msra.mxu1 %v3337_v55 }
 0x94d   : > { %4654 = vmatpush3.bf16.msra.mxu0 %v3291_v51  ;;  %4655 = vmatprep.mubr.msk.bf16.mxu0 %vm4984_vm1, %v4983_v2 }
 0x94e   : > { %v4874_v42 = vpop.eup %4873  ;;  %4661 = vmatprep.mubr.msk.bf16.mxu1 %vm4984_vm1, %v4983_v2  ;;  %4665 = vmatprep.subr.bf16.mxu0 %v4983_v2 }
 0x94f   : > { %v4876_v57 = vpop.eup %4875  ;;  %v3186_v58 = vmul.f32 %v4874_v42, %v4866_v33  ;;  %4671 = vmatprep.subr.bf16.mxu1 %v4983_v2 }
 0x950   : > { %v3185_v59 = vmul.f32 %v4876_v57, %v4868_v34 }
 0x951   : > { %v3190_v60 = vpack.c.bf16 %v3186_v58, %v3186_v58 }
 0x952   : > { %v3189_v62 = vpack.c.bf16 %v3185_v59, %v3185_v59 }
 0x953   : > { %4662 = vmatmul.mubr.msk.bf16.vlgmr.msra.gmra.mrb[84].mxu1 %vm1532_vm3, %v3190_v60  ;;  %v4839_v60 = vld [vmem:[%s5204_s16] sm:$0xff]  }
 0x954   : > { %4656 = vmatmul.mubr.msk.bf16.vlgmr.msra.gmra.mrb[84].mxu0 %vm1532_vm3, %v3189_v62  ;;  %4672 = vmatpush3.bf16.msra.mxu1 %v3433_v61  ;;  %v4840_v61 = vld [vmem:[%s5204_s16 + $0x8] sm:$0xff]  }
 0x955   : > { %4666 = vmatpush3.bf16.msra.mxu0 %v3387_v0  ;;  %4667 = vmatprep.mubr.msk.bf16.mxu0 %vm4984_vm1, %v4983_v2 }
 0x956   : > { %4673 = vmatprep.mubr.msk.bf16.mxu1 %vm4984_vm1, %v4983_v2  ;;  %4677 = vmatprep.subr.bf16.mxu0 %v4983_v2 }
 0x957   : > { %4683 = vmatprep.subr.bf16.mxu1 %v4983_v2 }
 0xa1e   : > { %v3281_v5 = vpop.f32.mrb[80].mxu1 }
 0xa1f   : > { %v3235_v7 = vpop.f32.mrb[80].mxu0  ;;  %v3380_v8 = vpack.c.bf16 %v3281_v5, %v3281_v5  ;;  %v4651_v10 = vpop.f32.mrb[81].mxu1 }
 0xa20   : > { %v3379_v12 = vpack.c.bf16 %v3235_v7, %v3235_v7  ;;  %v4645_v13 = vpop.f32.mrb[81].mxu0  ;;  %v3284_v14 = vpop.f32.mrb[82].mxu1 }
 0xa21   : > { %v3238_v16 = vpop.f32.mrb[82].mxu0  ;;  %v4652_v17 = vpop.f32.mrb[83].mxu1  ;;  %4674 = vmatmul.mubr.msk.bf16.vlgmr.msra.gmra.mrb[88].mxu1 %vm1532_vm3, %v3380_v8  ;;  %v3603_v8 = vrot.slane %v756_v3, %v5447_v1  ;;  %v4841_v13 = vld [vmem:[%s5204_s16 + $0x10] sm:$0xff]   ;;  %v4842_v14 = vld [vmem:[%s5204_s16 + $0x18] sm:$0xff]   ;;  %s5795_s16 = sld [smem:[#allocation26_spill]] (!%p4212_p1) }
 0xa22   : > { %v4646_v18 = vpop.f32.mrb[83].mxu0  ;;  %4668 = vmatmul.mubr.msk.bf16.vlgmr.msra.gmra.mrb[88].mxu0 %vm1532_vm3, %v3379_v12  ;;  %4684 = vmatpush3.bf16.msra.mxu1 %v3525_v11 }
 0xa23   : > { %4678 = vmatpush3.bf16.msra.mxu0 %v3479_v15  ;;  %4679 = vmatprep.mubr.msk.bf16.mxu0 %vm4984_vm1, %v4983_v2  ;;  %v3613_v15 = vld [vmem:[%s5210_s22] sm:$0x3] }
 0xa24   : > { %4685 = vmatprep.mubr.msk.bf16.mxu1 %vm4984_vm1, %v4983_v2  ;;  %4689 = vmatprep.subr.bf16.mxu0 %v4983_v2  ;;  %v3618_v16 = vrot.slane %v3613_v15, %v5444_v63 }
 0xa25   : > { %4697 = vmatprep.subr.bf16.mxu1 %v4983_v2 }
 0xa26   : > { %v3373_v19 = vpop.f32.mrb[84].mxu1 }
 0xa27   : > { %v3327_v20 = vpop.f32.mrb[84].mxu0  ;;  %v3382_v21 = vpack.c.bf16 %v3373_v19, %v3373_v19  ;;  %v4663_v22 = vpop.f32.mrb[85].mxu1 }
 0xa28   : > { %v3381_v23 = vpack.c.bf16 %v3327_v20, %v3327_v20  ;;  %v4657_v24 = vpop.f32.mrb[85].mxu0  ;;  %v3376_v25 = vpop.f32.mrb[86].mxu1 }
 0xa29   : > { %v3330_v26 = vpop.f32.mrb[86].mxu0  ;;  %v4664_v27 = vpop.f32.mrb[87].mxu1  ;;  %4686 = vmatmul.mubr.msk.bf16.vlgmr.msra.gmra.mrb[92].mxu1 %vm1532_vm3, %v3382_v21  ;;  %v3679_v24 = vrot.slane %v3613_v15, %v5447_v1 }
 0xa2a   : > { %v4658_v28 = vpop.f32.mrb[87].mxu0  ;;  %4680 = vmatmul.mubr.msk.bf16.vlgmr.msra.gmra.mrb[92].mxu0 %vm1532_vm3, %v3381_v23  ;;  %4701 = vmatprep.mubr.msk.bf16.mxu1 %vm4984_vm1, %v4983_v2 }
 0xa2b   : > { %4693 = vmatprep.mubr.msk.bf16.mxu0 %vm4984_vm1, %v4983_v2  ;;  %4690 = vmatpush3.bf16.msra.mxu0 %v4839_v60 }
 0xa2c   : > { %4691 = vmatprep.subr.bf16.mxu0 %v4983_v2  ;;  %4698 = vmatpush3.bf16.msra.mxu1 %v4841_v13 }
 0xa2d   : > { %4699 = vmatprep.subr.bf16.mxu1 %v4983_v2 }
 0xa2f   : > { %4692 = vmatpush3.bf16.msra.mxu0 %v4840_v61 }
 0xa30   : > { %4700 = vmatpush3.bf16.msra.mxu1 %v4842_v14 }
 0xaf4   : > { %v3469_v29 = vpop.f32.mrb[88].mxu1 }
 0xaf5   : > { %v3423_v30 = vpop.f32.mrb[88].mxu0  ;;  %v3568_v31 = vsel %vm860_vm2, %v3469_v29, 0.0  ;;  %v4675_v32 = vpop.f32.mrb[89].mxu1 }
 0xaf6   : > { %v3567_v33 = vsel %vm860_vm2, %v3423_v30, 0.0  ;;  %v4669_v34 = vpop.f32.mrb[89].mxu0  ;;  %v3472_v35 = vpop.f32.mrb[90].mxu1 }
 0xaf7   : > { %v3569_v36 = vadd.f32 %v3568_v31, %v3567_v33  ;;  %v3426_v37 = vpop.f32.mrb[90].mxu0  ;;  %v4676_v38 = vpop.f32.mrb[91].mxu1 }
 0xaf8   : > { %v4670_v39 = vpop.f32.mrb[91].mxu0 }
 0xaf9   : > { %v757_v39 = vld [vmem:[%s5216_s21 + $0x4] sm:$0x3] }
 0xafc   : > { %v3561_v40 = vpop.f32.mrb[92].mxu1 }
 0xafd   : > { %v3515_v41 = vpop.f32.mrb[92].mxu0  ;;  %v4687_v44 = vpop.f32.mrb[93].mxu1  ;;  %v3572_v52 = vsel %vm860_vm2, %v3561_v40, 0.0  ;;  %v3752_v40 = vrot.slane %v757_v39, %v5444_v63  ;;  %v4882_v63 = vld [vmem:[%s5795_s16 + $0x8] sm:$0xff] (!%p4212_p1)  }
 0xafe   : > { %v3570_v45 = vsel %vm860_vm2, %v3515_v41, 0.0  ;;  %v4681_v46 = vpop.f32.mrb[93].mxu0  ;;  %v3564_v47 = vpop.f32.mrb[94].mxu1  ;;  %v3757_v44 = vrot.slane %v757_v39, %v5447_v1 }
 0xaff   : > { %v3571_v48 = vadd.f32 %v3570_v45, %v3569_v36  ;;  %v3518_v49 = vpop.f32.mrb[94].mxu0  ;;  %v4688_v50 = vpop.f32.mrb[95].mxu1 }
 0xb00   : > { %v4682_v53 = vpop.f32.mrb[95].mxu0  ;;  %v4985_v49 = vmov (!%p4212_p1), 0.0   ;;  %v4213_v50 = vld [vmem:[%s5796_s25] ss:$0 sm:$0xff] (!%p4212_p1) }
 0xb01   : > { %v3573_v54 = vadd.f32 %v3572_v52, %v3571_v48  ;;  %v4881_v48 = vld [vmem:[%s5795_s16] sm:$0xff] (!%p4212_p1)   ;;  %4705 = vmatprep.subr.bf16.mxu0 (!%p4212_p1), %v4985_v49 }
 0xb03   : > { %v3580_v55 = vadd.f32 %v4205_v43, %v3573_v54 }
 0xb05   : > { %v3581_v51 = vadd.f32 %v3580_v55, %v5451_v9 }
 0xb07   : > { %v3582_v42 = vsel %vm860_vm2, %v3581_v51, 0.0 }
 0xb08   : > { %3583 = vadd.xlane.f32.xlu0 %v3582_v42 }
 0xb95   : > { %v3584_v56 = vpop.xlane.xlu0 %3583 }
 0xb96   : > { %v3585_v57 = vmul.f32 0.03125, %v3584_v56 }
 0xb98   : > { %v3586_v58 = vsub.f32 %v3581_v51, %v3585_v57 }
 0xb9a   : > { %v3587_v6 = vmul.f32 %v3586_v58, %v3586_v58 }
 0xb9c   : > { %v3588_v59 = vsel %vm860_vm2, %v3587_v6, 0.0 }
 0xb9d   : > { %3589 = vadd.xlane.f32.xlu1 %v3588_v59 }
 0xc2a   : > { %v3590_v62 = vpop.xlane.xlu1 %3589 }
 0xc2b   : > { %v3591_v9 = vmul.f32 0.03125, %v3590_v62 }
 0xc2d   : > { %v3592_v0 = vadd.f32 1e-05, %v3591_v9 }
 0xc2f   : > { %4877 = vrsqrt.f32 %v3592_v0 }
 0xc39   : > { %v4878_v5 = vpop.eup %4877 }
 0xc3a   : > { %v3594_v7 = vmul.f32 %v4878_v5, %v3586_v58 }
 0xc3c   : > { %v3599_v10 = vmul.f32 %v3598_v4, %v3594_v7 }
 0xc3e   : > { %v3604_v11 = vadd.f32 %v3603_v8, %v3599_v10 }
 0xc40   : > { %v3614_v12 = vpack.c.bf16 %v3604_v11, %v3604_v11 }
 0xc42   : > { %4694 = vmatmul.mubr.msk.bf16.vlgmr.msra.gmra.mrb[96].mxu0 %vm860_vm2, %v3614_v12 }
 0xc43   : > { %4706 = vmatpush3.bf16.msra.mxu0 (!%p4212_p1), %v4881_v48  ;;  %4709 = vmatprep.mubr.msk.bf16.mxu0 (!%p4212_p1), %vm4986_vm5, %v4985_v49 }
 0xc44   : > { %4707 = vmatprep.subr.bf16.mxu0 (!%p4212_p1), %v4985_v49 }
 0xc47   : > { %4708 = vmatpush3.bf16.msra.mxu0 (!%p4212_p1), %v4882_v63 }
 0xd15   : > { %v3668_v17 = vpop.f32.mrb[96].mxu0 }
 0xd16   : > { %v3669_v18 = vadd.f32 %v3668_v17, %v3618_v16  ;;  %v4695_v19 = vpop.f32.mrb[97].mxu0 }
 0xd17   : > { %v3671_v20 = vpop.f32.mrb[98].mxu0 }
 0xd18   : > { %v3674_v21 = vmax.f32 %v3669_v18, 0.0  ;;  %v4696_v22 = vpop.f32.mrb[99].mxu0 }
 0xd1a   : > { %v3675_v23 = vpack.c.bf16 %v3674_v21, %v3674_v21 }
 0xd1c   : > { %4702 = vmatmul.mubr.msk.bf16.vlgmr.msra.gmra.mrb[96].mxu1 %vm860_vm2, %v3675_v23 }
 0xdef   : > { %v3729_v25 = vpop.f32.mrb[96].mxu1 }
 0xdf0   : > { %v3730_v26 = vadd.f32 %v3729_v25, %v3679_v24  ;;  %v4703_v27 = vpop.f32.mrb[97].mxu1 }
 0xdf1   : > { %v3732_v2 = vpop.f32.mrb[98].mxu1 }
 0xdf2   : > { %v4704_v28 = vpop.f32.mrb[99].mxu1  ;;  %v3735_v29 = vadd.f32 %v3730_v26, %v3604_v11 }
 0xdf4   : > { %v3736_v30 = vsel %vm860_vm2, %v3735_v29, 0.0 }
 0xdf5   : > { %3737 = vadd.xlane.f32.xlu0 %v3736_v30 }
 0xe82   : > { %v3738_v31 = vpop.xlane.xlu0 %3737 }
 0xe83   : > { %v3739_v32 = vmul.f32 0.03125, %v3738_v31 }
 0xe85   : > { %v3740_v33 = vsub.f32 %v3735_v29, %v3739_v32 }
 0xe87   : > { %v3741_v34 = vmul.f32 %v3740_v33, %v3740_v33 }
 0xe89   : > { %v3742_v35 = vsel %vm860_vm2, %v3741_v34, 0.0 }
 0xe8a   : > { %3743 = vadd.xlane.f32.xlu1 %v3742_v35 }
 0xf17   : > { %v3744_v36 = vpop.xlane.xlu1 %3743 }
 0xf18   : > { %v3745_v37 = vmul.f32 0.03125, %v3744_v36 }
 0xf1a   : > { %v3746_v38 = vadd.f32 1e-05, %v3745_v37 }
 0xf1c   : > { %4879 = vrsqrt.f32 %v3746_v38 }
 0xf26   : > { %v4880_v41 = vpop.eup %4879 }
 0xf27   : > { %v3748_v45 = vmul.f32 %v4880_v41, %v3740_v33  ;;  %3763 = sbr.rel (%p4212_p1) target bundleno = 4416 (0x1140), region = 92 }
 0xf29   : > { %v3753_v46 = vmul.f32 %v3752_v40, %v3748_v45 }
 0xf2b   : > { %v3758_v47 = vadd.f32 %v3757_v44, %v3753_v46 }
 0xf2d   : > { %3759 = vst.msk [vmem:[%s5218_s23] sm:$0xff] %vm860_vm2, %v3758_v47  ;;  %v3768_v1 = vpack.c.bf16 (!%p4212_p1), %v3758_v47, %v3758_v47 }
 0xf2f   : > { %4710 = vmatmul.mubr.msk.bf16.vlgmr.msra.gmra.mrb[0].mxu0 %vm860_vm2, %v3768_v1 }
0x1002   : > { %v3825_v43 = vpop.f32.mrb[0].mxu0 }
0x1003   : > { %v3826_v52 = vadd.f32 %v4213_v50, %v3825_v43  ;;  %v4711_v53 = vpop.f32.mrb[1].mxu0 }
0x1004   : > { %v3828_v54 = vpop.f32.mrb[2].mxu0 }
0x1005   : > { %v4712_v55 = vpop.f32.mrb[3].mxu0  ;;  %v3831_v51 = vsel %vm860_vm2, %v3826_v52, -inf }
0x1006   : > { %3832 = vmax.xlane.f32.xlu0 %v3831_v51 }
0x1093   : > { %v3833_v42 = vpop.xlane.xlu0 %3832 }
0x1094   : > { %v3834_v56 = vsub.f32 %v3826_v52, %v3833_v42 }
0x1096   : > { %v3835_v57 = vmul.f32 1.442695, %v3834_v56 }
0x1098   : > { %4883 = vpow2.f32 %v3835_v57 }
0x10a2   : > { %v4884_v58 = vpop.eup %4883 }
0x10a3   : > { %v3837_v6 = vsel %vm860_vm2, %v4884_v58, 0.0 }
0x10a4   : > { %3838 = vadd.xlane.f32.xlu0 %v3837_v6 }
0x1131   : > { %v3839_v59 = vpop.xlane.xlu0 %3838 }
0x1132   : > { %4885 = vrcp.f32 %v3839_v59 }
0x113c   : > { %v4886_v60 = vpop.eup %4885 }
0x113d   : > { %v3841_v61 = vmul.f32 %v4886_v60, %v4884_v58 }
0x113f   : > { %3842 = vst.msk [vmem:[%s5218_s23] sm:$0xff] %vm860_vm2, %v3841_v61 }
0x1140 PF: > { %s5797_s3 = sld [smem:[#allocation9_spill]]  ;;  %s5798_s18 = sld [smem:[#allocation6_spill]] }
0x1141   : > { %s5800_s26 = sld [smem:[#allocation28_spill]]  ;;  %s3857_s0 = sshll.u32 %s5218_s23, 4  ;;  %s3858_s0 = int_to_ptr.vmem [resolvable:$true] %s3857_s0 }
0x1142   : > { %s4887_s15 = scalar_lea.vmem %s3858_s0, 128  ;;  %s4987_s2 = smov [#allocation2]  }
0x1143   : > { %p4888_p2 = scmp.ne.s32.totalorder %s3858_s0, %s4887_s15  ;;  %s4891_s19 = sshll.u32 %s4987_s2, 4  ;;  %s4892_s19 = int_to_ptr.vmem [resolvable:$false] %s4891_s19 }
0x1144   : > { %s4893_s27 = scalar_lea.vmem %s4892_s19, 256  ;;  %p4894_p6 = scmp.lt.s32.totalorder %s3858_s0, %s4892_s19 }
0x1145   : > { %p4889_p4 = pnand %p4888_p2, %p5122_p3  ;;  %p4895_p7 = scmp.lt.s32.totalorder %s4893_s27, %s4887_s15 }
0x1146   : > { %s4218_s29 = sshll.u32 %s5797_s3, 7  ;;  %s5802_s17 = sand.u32 1, %s5798_s18  }
0x1147   : > { %s5801_s1 = smov %s5800_s26  ;;  %s5674_s14 = scalar_lea.hbm %s5800_s26, %s4218_s29 }
0x1148   : > { %s3844_s20 = scalar_lea.sflag [#allocation3], %s5802_s17  ;;  %p4890_p5 = pneg %p4889_p4 }
0x1149   : > { %p4896_p8 = por %p4895_p7, %p4894_p6 }
0x114b   : > { %p4897_p10 = pnand %p4896_p8, %p4890_p5 }
0x114d   : > { %4900 = shalt.err (!%p4897_p10)
}
0x114e   : > { %s4901_s23 = scalar_lea.hbm %s5674_s14, 128  ;;  %s4905_s30 = scalar_lea.hbm %s5801_s1, 256 }
0x114f   : > { %p4902_p11 = scmp.ne.s32.totalorder %s5674_s14, %s4901_s23  ;;  %p4906_p0 = scmp.lt.u32.totalorder %s5674_s14, %s5801_s1 }
0x1150   : > { %p4907_p1 = scmp.lt.u32.totalorder %s4905_s30, %s4901_s23  ;;  %p4909_p4 = scmp.lt.u32.totalorder %s4901_s23, %s5674_s14 }
0x1151   : > { %p4903_p12 = pnand %p4902_p11, %p5122_p3 }
0x1152   : > { %p4908_p2 = por %p4907_p1, %p4906_p0 }
0x1153   : > { %p4904_p13 = pneg %p4903_p12 }
0x1154   : > { %p4910_p5 = por %p4909_p4, %p4908_p2 }
0x1156   : > { %p4911_p6 = pnand %p4910_p5, %p4904_p13 }
0x1158   : > { %4914 = shalt.err (!%p4911_p6)
}
0x1159   : > { %4716 = dma.vmem_to_hbm [thread:$0]  (%p5122_p3), %s3858_s0, 128, %s5674_s14, %s3844_s20  }
0x115a PF: > { %s5803_s25 = sld [smem:[#allocation12_spill]]  ;;  %s5804_s3 = sld [smem:[#allocation5_spill]] }
0x1160   : > { %p4722_p7 = scmp.ge.s32.totalorder %s5803_s25, 2  ;;  %s3869_s29 = sand.u32 1, %s5804_s3  }
0x1161   : > { %s3870_s4 = scalar_lea.sflag [#allocation3], %s3869_s29 }
0x1162   : > { %p4719_p8 = pnand %p4722_p7, %p5132_p9 }
0x1164   : > { %4948 = dma.done.wait (!%p4719_p8), %s3870_s4, 128  }
0x1165   : > { %4950 = vsyncadd (!%p4719_p8), %s3870_s4, 4294967168  ;;  %s29_s28 = sadd.s32 1, %s5803_s25   ;;  %s5806_s21 = sld [smem:[#allocation6_spill]] }
0x1166   : > { %p26_p10 = scmp.ge.s32.totalorder %s29_s28, 6   ;;  %s5807_s22 = sld [smem:[#allocation7_spill]] }
0x1167   : > { %s5808_s23 = sld [smem:[#allocation17_spill]]  ;;  %s5809_s24 = sld [smem:[#allocation10_spill]] }
0x1168   : > { %s5810_s25 = sld [smem:[#allocation11_spill]]  ;;  %s5811_s26 = sld [smem:[#allocation13_spill]] }
0x1169   : > { %s5812_s27 = sld [smem:[#allocation15_spill]]  ;;  %28 = sbr.rel (!%p26_p10) target bundleno = 16 (0x10), region = 163 }
0x1170   :  { %3875 = vsyncpa [#allocation3], 1 }
0x1171   :  { %3877 = vsyncpa [#allocation3 + $0x1], 1 }

</bundles_post_ra>
